<compile_context>
chip_gen: v7x
topology: tpu7x:2x2x1
jax: 0.10.0
libtpu: 0.0.40
codegen_flags: <defaults>
</compile_context>

<pallas_src>
import math
import functools

import jax
import jax.numpy as jnp
import numpy as np
from jax.experimental import pallas as pl
from jax.experimental.pallas import tpu as pltpu


_SQRT1_2 = 1.0 / math.sqrt(2.0)


def _erf_approx(x):
    # Abramowitz & Stegun 7.1.26 (|error| < 1.5e-7 + approx-reciprocal error).
    # Only exp / mul / add / where + one EUP reciprocal -> lowers cleanly.
    a1, a2, a3, a4, a5 = (0.254829592, -0.284496736, 1.421413741,
                          -1.453152027, 1.061405429)
    p = 0.3275911
    ax = jnp.abs(x)
    t = pl.reciprocal(1.0 + p * ax, approx=True)      # EUP slot, not VALU divide
    poly = ((((a5 * t + a4) * t + a3) * t + a2) * t + a1) * t
    y = 1.0 - poly * jnp.exp(-ax * ax)
    return jnp.where(x < 0.0, -y, y)


def _gelu(x):
    # BERT's exact (erf-based) gelu.
    return x * 0.5 * (1.0 + _erf_approx(x * _SQRT1_2))


def _layer_norm(x, gamma, beta, eps):
    mu = jnp.mean(x, axis=-1, keepdims=True)
    xc = x - mu
    var = jnp.mean(xc * xc, axis=-1, keepdims=True)
    return xc * jax.lax.rsqrt(var + eps) * gamma + beta


def _swap_leading(x):
    """(a, b, d) -> (b, a, d), keeping the minor (lane) dim in place."""
    if hasattr(pltpu, "einshape"):
        return pltpu.einshape("abd->bad", x)
    return jnp.swapaxes(x, 0, 1)


def _bert_layer_kernel(x_ref, mask_ref,
                       wq_ref, bq_ref, wkv_ref, bkv_ref,
                       wo_ref, bo_ref, g1_ref, be1_ref,
                       wi_ref, bi_ref, wo2_ref, bo2_ref,
                       g2_ref, be2_ref,
                       out_ref,
                       k_scratch, v_scratch,
                       *, num_heads, head_size, eps, tq, ff_blk):
    nh, hd = num_heads, head_size
    H = nh * hd
    S = k_scratch.shape[1]
    d_ff = wi_ref.shape[1]
    bf16 = jnp.bfloat16
    f32 = jnp.float32

    t = pl.program_id(1)

    # ---- K/V projection: once per batch element, stored head-major in bf16 ----
    @pl.when(t == 0)
    def _():
        x_full_bf = x_ref[0].astype(bf16)                               # (S, H)
        kv = jnp.dot(x_full_bf, wkv_ref[...],
                     preferred_element_type=f32) + bkv_ref[...]         # (S, 2H)
        kv = kv.astype(bf16)
        k_scratch[...] = _swap_leading(kv[:, :H].reshape(S, nh, hd))    # (nh, S, hd)
        v_scratch[...] = _swap_leading(kv[:, H:].reshape(S, nh, hd))    # (nh, S, hd)

    # ---- Q projection for this query tile (1/sqrt(hd) folded into Wq/bq) ----
    q_start = pl.multiple_of(t * tq, tq)
    x_q = x_ref[0, pl.ds(q_start, tq), :]                               # (tq, H) f32 residual
    q = jnp.dot(x_q.astype(bf16), wq_ref[...],
                preferred_element_type=f32) + bq_ref[...]               # (tq, H)
    q3 = _swap_leading(q.astype(bf16).reshape(tq, nh, hd))              # (nh, tq, hd)

    k3 = k_scratch[...]                                                 # (nh, S, hd) bf16
    v3 = v_scratch[...]                                                 # (nh, S, hd) bf16

    # ---- scaled dot-product attention, batched over heads ----
    scores = jnp.einsum('hqd,hkd->hqk', q3, k3,
                        preferred_element_type=f32)                     # (nh, tq, S)
    scores = scores + mask_ref[...]                                     # (1,1,S) broadcast
    scores = scores - jnp.max(scores, axis=-1, keepdims=True)           # stable softmax
    probs = jnp.exp(scores)
    denom = jnp.sum(probs, axis=-1, keepdims=True)
    probs = probs * pl.reciprocal(denom, approx=True)
    # dropout(attention_probs): identity in eval mode

    ctx = jnp.einsum('hqk,hkd->hqd', probs.astype(bf16), v3,
                     preferred_element_type=f32)                        # (nh, tq, hd)
    context = _swap_leading(ctx).reshape(tq, H)                         # (tq, H)

    # ---- BertSelfOutput: dense -> (dropout) -> residual -> LayerNorm ----
    attn = jnp.dot(context.astype(bf16), wo_ref[...],
                   preferred_element_type=f32) + bo_ref[...]
    attn = _layer_norm(attn + x_q, g1_ref[...], be1_ref[...], eps)
    attn_bf = attn.astype(bf16)

    # ---- BertIntermediate + BertOutput, blocked over d_ff ----
    y = jnp.zeros((tq, H), f32) + bo2_ref[...]
    for f in range(d_ff // ff_blk):
        lo = f * ff_blk
        inter = jnp.dot(attn_bf, wi_ref[:, lo:lo + ff_blk],
                        preferred_element_type=f32) + bi_ref[:, lo:lo + ff_blk]
        inter = _gelu(inter)
        y = y + jnp.dot(inter.astype(bf16), wo2_ref[lo:lo + ff_blk, :],
                        preferred_element_type=f32)
    y = _layer_norm(y + attn, g2_ref[...], be2_ref[...], eps)

    out_ref[0] = y.astype(out_ref.dtype)


def _pick_query_tile(S):
    if S <= 256:
        return S
    for t in (256, 128, 64, 32, 16, 8):
        if S % t == 0:
            return t
    return S


def _pick_ff_block(d_ff):
    if d_ff <= 1024:
        return d_ff
    for blk in (1024, 768, 512, 384, 256, 128):
        if d_ff % blk == 0:
            return blk
    return d_ff


def _invariant_spec(shape):
    """BlockSpec for a grid-invariant operand; single-buffered when supported."""
    rep = lambda b, t: tuple(0 for _ in shape)
    if hasattr(pl, "Buffered"):
        try:
            return pl.BlockSpec(shape, rep, pipeline_mode=pl.Buffered(1))
        except TypeError:
            pass
    return pl.BlockSpec(shape, rep)


def _vmem_limit_bytes(S, H, d_ff, tq, nh, ff_blk):
    # Explicit working-set budget (bytes).
    w = (H * H + H * 2 * H + H * H + H * d_ff + d_ff * H) * 2      # bf16 weights, 1-buffered
    b = (H + 2 * H + H + d_ff + H + 4 * H) * 4                     # biases + LN params, f32
    x = 2 * S * H * 4                                              # x block, double-buffered
    kv = 2 * nh * S * (H // nh) * 2                                # K/V scratch, bf16
    attn = nh * tq * S * 4 * 2                                     # scores + probs, f32
    ffn = tq * ff_blk * 4 * 2                                      # inter block + gelu temps
    out = 2 * tq * H * 4                                           # output block
    budget = int((w + b + x + kv + attn + ffn + out) * 1.5) + (4 << 20)
    limit = max(32 << 20, budget)
    try:
        cap = int(pltpu.get_tpu_info().vmem_capacity_bytes)
    except Exception:
        cap = 104 << 20
    return min(limit, cap - (4 << 20))


def bert_layer(hidden_states, attention_mask, params,
               *, num_heads, layer_norm_eps=1e-12):
    """hidden_states: (B, S, H) f32; attention_mask: (B, 1, 1, S) additive."""
    B, S, H = hidden_states.shape
    d_ff = params["w_inter"].shape[0]            # intermediate_size
    head_size = H // num_heads
    tq = _pick_query_tile(S)
    n_q = S // tq
    ff_blk = _pick_ff_block(d_ff)
    scale = 1.0 / math.sqrt(head_size)

    mask3 = attention_mask.reshape(B, 1, S).astype(jnp.float32)

    bf16 = jnp.bfloat16
    f32 = jnp.float32
    # Pre-transpose nn.Linear weights (out, in) -> (in, out); cast to bf16.
    # 1/sqrt(head_size) is folded into the query projection.
    wq = (params["wq"] * scale).T.astype(bf16)                                 # (H, H)
    wkv = jnp.concatenate([params["wk"].T, params["wv"].T], axis=1).astype(bf16)  # (H, 2H)
    wo = params["wo"].T.astype(bf16)                                           # (H, H)
    wi = params["w_inter"].T.astype(bf16)                                      # (H, d_ff)
    wo2 = params["w_out"].T.astype(bf16)                                       # (d_ff, H)

    bq = (params["bq"] * scale).reshape(1, H).astype(f32)
    bkv = jnp.concatenate([params["bk"], params["bv"]]).reshape(1, 2 * H).astype(f32)
    bo = params["bo"].reshape(1, H).astype(f32)
    bi = params["b_inter"].reshape(1, d_ff).astype(f32)
    bo2 = params["b_out"].reshape(1, H).astype(f32)
    g1 = params["ln1_gamma"].reshape(1, H).astype(f32)
    be1 = params["ln1_beta"].reshape(1, H).astype(f32)
    g2 = params["ln2_gamma"].reshape(1, H).astype(f32)
    be2 = params["ln2_beta"].reshape(1, H).astype(f32)

    kernel = functools.partial(_bert_layer_kernel,
                               num_heads=num_heads, head_size=head_size,
                               eps=layer_norm_eps, tq=tq, ff_blk=ff_blk)

    in_specs = [
        # hidden_states: full sequence per batch element; block index only
        # changes with b, so it is DMA'd once per batch element.
        pl.BlockSpec((1, S, H), lambda b, t: (b, 0, 0)),
        pl.BlockSpec((1, 1, S), lambda b, t: (b, 0, 0)),   # additive attention mask
        _invariant_spec((H, H)),                           # Wq (scaled)
        _invariant_spec((1, H)),                           # bq (scaled)
        _invariant_spec((H, 2 * H)),                       # Wk|Wv fused
        _invariant_spec((1, 2 * H)),                       # bk|bv fused
        _invariant_spec((H, H)),                           # Wo (attention output dense)
        _invariant_spec((1, H)),                           # bo
        _invariant_spec((1, H)),                           # LN1 gamma
        _invariant_spec((1, H)),                           # LN1 beta
        _invariant_spec((H, d_ff)),                        # W intermediate
        _invariant_spec((1, d_ff)),                        # b intermediate
        _invariant_spec((d_ff, H)),                        # W output
        _invariant_spec((1, H)),                           # b output
        _invariant_spec((1, H)),                           # LN2 gamma
        _invariant_spec((1, H)),                           # LN2 beta
    ]

    return pl.pallas_call(
        kernel,
        out_shape=jax.ShapeDtypeStruct((B, S, H), jnp.float32),
        grid_spec=pltpu.PrefetchScalarGridSpec(
            num_scalar_prefetch=0,
            grid=(B, n_q),
            in_specs=in_specs,
            out_specs=pl.BlockSpec((1, tq, H), lambda b, t: (b, t, 0)),
            scratch_shapes=[pltpu.VMEM((num_heads, S, head_size), bf16),   # K (head-major)
                            pltpu.VMEM((num_heads, S, head_size), bf16)],  # V (head-major)
        ),
        compiler_params=pltpu.CompilerParams(
            dimension_semantics=("parallel", "arbitrary"),
            vmem_limit_bytes=_vmem_limit_bytes(S, H, d_ff, tq, num_heads, ff_blk)),
    )(hidden_states, mask3, wq, bq, wkv, bkv, wo, bo, g1, be1,
      wi, bi, wo2, bo2, g2, be2)


def _reference(hidden_states, attention_mask, params, *, num_heads, eps=1e-12):
    """Pure-JAX f32 reference mirroring the PyTorch BertLayer forward (eval mode)."""
    B, S, H = hidden_states.shape
    hd = H // num_heads

    def linear(x, w, b):
        return jnp.einsum("bsh,oh->bso", x, w) + b

    def layer_norm(y, g, b):
        mu = jnp.mean(y, -1, keepdims=True)
        var = jnp.mean(jnp.square(y - mu), -1, keepdims=True)
        return (y - mu) / jnp.sqrt(var + eps) * g + b

    q = linear(hidden_states, params["wq"], params["bq"])
    k = linear(hidden_states, params["wk"], params["bk"])
    v = linear(hidden_states, params["wv"], params["bv"])

    def split(x):
        return x.reshape(B, S, num_heads, hd).transpose(0, 2, 1, 3)

    q, k, v = split(q), split(k), split(v)
    scores = jnp.einsum("bhqd,bhkd->bhqk", q, k) / math.sqrt(hd)
    scores = scores + attention_mask
    probs = jax.nn.softmax(scores, axis=-1)
    ctx = jnp.einsum("bhqk,bhkd->bhqd", probs, v)
    ctx = ctx.transpose(0, 2, 1, 3).reshape(B, S, H)

    attn = layer_norm(linear(ctx, params["wo"], params["bo"]) + hidden_states,
                      params["ln1_gamma"], params["ln1_beta"])

    inter = linear(attn, params["w_inter"], params["b_inter"])
    inter = inter * 0.5 * (1.0 + jax.lax.erf(inter / math.sqrt(2.0)))   # exact gelu
    out = layer_norm(linear(inter, params["w_out"], params["b_out"]) + attn,
                     params["ln2_gamma"], params["ln2_beta"])
    return out


if __name__ == "__main__":
    # Small BERT-style config: batch=2, seq=8, hidden=32, heads=4, ffn=128.
    B, S, H = 2, 8, 32
    num_heads = 4
    d_ff = 4 * H

    key = jax.random.PRNGKey(0)
    keys = jax.random.split(key, 14)

    def lin_w(k, o, i):
        return jax.random.normal(k, (o, i), jnp.float32) * 0.05

    def lin_b(k, o):
        return jax.random.normal(k, (o,), jnp.float32) * 0.05

    params = {
        # nn.Linear weights stored PyTorch-style: (out_features, in_features)
        "wq": lin_w(keys[0], H, H), "bq": lin_b(keys[1], H),
        "wk": lin_w(keys[2], H, H), "bk": lin_b(keys[3], H),
        "wv": lin_w(keys[4], H, H), "bv": lin_b(keys[5], H),
        "wo": lin_w(keys[6], H, H), "bo": lin_b(keys[7], H),
        "ln1_gamma": jnp.ones((H,), jnp.float32),
        "ln1_beta": jnp.zeros((H,), jnp.float32),
        "w_inter": lin_w(keys[8], d_ff, H), "b_inter": lin_b(keys[9], d_ff),
        "w_out": lin_w(keys[10], H, d_ff), "b_out": lin_b(keys[11], H),
        "ln2_gamma": jnp.ones((H,), jnp.float32),
        "ln2_beta": jnp.zeros((H,), jnp.float32),
    }

    hidden_states = jax.random.normal(keys[12], (B, S, H), jnp.float32)

    # Additive attention mask (B, 1, 1, S): last two key positions of batch 1 masked.
    pad = jnp.ones((B, S), jnp.float32).at[1, -2:].set(0.0)
    attention_mask = (1.0 - pad)[:, None, None, :] * -10000.0

    out = bert_layer(hidden_states, attention_mask, params, num_heads=num_heads)
    out = jax.block_until_ready(out)

    ref = _reference(hidden_states, attention_mask, params, num_heads=num_heads)
    # bf16 MXU operands (f32 accumulation) + approx reciprocals -> loosen tolerance.
    np.testing.assert_allclose(np.asarray(out), np.asarray(ref), rtol=2e-2, atol=2e-2)

    print("KERNEL_OK")
</pallas_src>

<mosaic_0001>
module attributes {stable_mosaic.version = 11 : i64} {
  func.func @_bert_layer_kernel(%arg0: i32, %arg1: i32, %arg2: memref<1x8x32xf32, #tpu.memory_space<vmem>>, %arg3: memref<1x1x8xf32, #tpu.memory_space<vmem>>, %arg4: memref<32x32xbf16, #tpu.memory_space<vmem>>, %arg5: memref<1x32xf32, #tpu.memory_space<vmem>>, %arg6: memref<32x64xbf16, #tpu.memory_space<vmem>>, %arg7: memref<1x64xf32, #tpu.memory_space<vmem>>, %arg8: memref<32x32xbf16, #tpu.memory_space<vmem>>, %arg9: memref<1x32xf32, #tpu.memory_space<vmem>>, %arg10: memref<1x32xf32, #tpu.memory_space<vmem>>, %arg11: memref<1x32xf32, #tpu.memory_space<vmem>>, %arg12: memref<32x128xbf16, #tpu.memory_space<vmem>>, %arg13: memref<1x128xf32, #tpu.memory_space<vmem>>, %arg14: memref<128x32xbf16, #tpu.memory_space<vmem>>, %arg15: memref<1x32xf32, #tpu.memory_space<vmem>>, %arg16: memref<1x32xf32, #tpu.memory_space<vmem>>, %arg17: memref<1x32xf32, #tpu.memory_space<vmem>>, %arg18: memref<1x8x32xf32, #tpu.memory_space<vmem>>, %arg19: memref<4x8x8xbf16, #tpu.memory_space<vmem>>, %arg20: memref<4x8x8xbf16, #tpu.memory_space<vmem>>) attributes {dimension_semantics = [#tpu.dimension_semantics<parallel>, #tpu.dimension_semantics<arbitrary>], iteration_bounds = array<i64: 2, 1>, scalar_prefetch = 0 : i64, scratch_operands = 2 : i64, tpu.core_type = #tpu.core_type<tc>, window_params = [{transform_indices = @transform_0, window_bounds = array<i64: 1, 8, 32>}, {transform_indices = @transform_1, window_bounds = array<i64: 1, 1, 8>}, {pipeline_mode = #tpu.pipeline_mode<synchronous>, transform_indices = @transform_2, window_bounds = array<i64: 32, 32>}, {pipeline_mode = #tpu.pipeline_mode<synchronous>, transform_indices = @transform_3, window_bounds = array<i64: 1, 32>}, {pipeline_mode = #tpu.pipeline_mode<synchronous>, transform_indices = @transform_4, window_bounds = array<i64: 32, 64>}, {pipeline_mode = #tpu.pipeline_mode<synchronous>, transform_indices = @transform_5, window_bounds = array<i64: 1, 64>}, {pipeline_mode = #tpu.pipeline_mode<synchronous>, transform_indices = @transform_6, window_bounds = array<i64: 32, 32>}, {pipeline_mode = #tpu.pipeline_mode<synchronous>, transform_indices = @transform_7, window_bounds = array<i64: 1, 32>}, {pipeline_mode = #tpu.pipeline_mode<synchronous>, transform_indices = @transform_8, window_bounds = array<i64: 1, 32>}, {pipeline_mode = #tpu.pipeline_mode<synchronous>, transform_indices = @transform_9, window_bounds = array<i64: 1, 32>}, {pipeline_mode = #tpu.pipeline_mode<synchronous>, transform_indices = @transform_10, window_bounds = array<i64: 32, 128>}, {pipeline_mode = #tpu.pipeline_mode<synchronous>, transform_indices = @transform_11, window_bounds = array<i64: 1, 128>}, {pipeline_mode = #tpu.pipeline_mode<synchronous>, transform_indices = @transform_12, window_bounds = array<i64: 128, 32>}, {pipeline_mode = #tpu.pipeline_mode<synchronous>, transform_indices = @transform_13, window_bounds = array<i64: 1, 32>}, {pipeline_mode = #tpu.pipeline_mode<synchronous>, transform_indices = @transform_14, window_bounds = array<i64: 1, 32>}, {pipeline_mode = #tpu.pipeline_mode<synchronous>, transform_indices = @transform_15, window_bounds = array<i64: 1, 32>}, {transform_indices = @transform_16, window_bounds = array<i64: 1, 8, 32>}]} {
    %c0_i32 = arith.constant 0 : i32
    %0 = arith.cmpi eq, %arg1, %c0_i32 : i32
    %1 = arith.extui %0 : i1 to i32
    %c0_i32_0 = arith.constant 0 : i32
    %2 = arith.cmpi ne, %1, %c0_i32_0 : i32
    scf.if %2 {
      %c0_70 = arith.constant 0 : index
      %c0_71 = arith.constant 0 : index
      %c0_72 = arith.constant 0 : index
      %145 = vector.load %arg2[%c0_70, %c0_71, %c0_72] : memref<1x8x32xf32, #tpu.memory_space<vmem>>, vector<1x8x32xf32>
      %146 = vector.shape_cast %145 : vector<1x8x32xf32> to vector<8x32xf32>
      %147 = arith.truncf %146 : vector<8x32xf32> to vector<8x32xbf16>
      %c0_73 = arith.constant 0 : index
      %c0_74 = arith.constant 0 : index
      %148 = vector.load %arg6[%c0_73, %c0_74] : memref<32x64xbf16, #tpu.memory_space<vmem>>, vector<32x64xbf16>
      %cst_75 = arith.constant dense<0.000000e+00> : vector<8x64xf32>
      %149 = tpu.matmul %147, %148, %cst_75 {dimension_numbers = #tpu.dot_dimension_numbers<[1], [0], [0], [1], [0, 0, 1, 1], [], []>} : vector<8x32xbf16>, vector<32x64xbf16>, vector<8x64xf32> -> vector<8x64xf32>
      %c0_76 = arith.constant 0 : index
      %c0_77 = arith.constant 0 : index
      %150 = vector.load %arg7[%c0_76, %c0_77] : memref<1x64xf32, #tpu.memory_space<vmem>>, vector<1x64xf32>
      %151 = vector.broadcast %150 : vector<1x64xf32> to vector<8x64xf32>
      %152 = arith.addf %149, %151 : vector<8x64xf32>
      %153 = arith.truncf %152 : vector<8x64xf32> to vector<8x64xbf16>
      %154 = vector.extract_strided_slice %153 {offsets = [0, 0], sizes = [8, 32], strides = [1, 1]} : vector<8x64xbf16> to vector<8x32xbf16>
      %155 = vector.shape_cast %154 : vector<8x32xbf16> to vector<8x4x8xbf16>
      %156 = tpu.transpose %155, [1, 0, 2] : vector<8x4x8xbf16> -> vector<4x8x8xbf16>
      %c0_78 = arith.constant 0 : index
      %c0_79 = arith.constant 0 : index
      %c0_80 = arith.constant 0 : index
      %157 = vector.load %arg19[%c0_78, %c0_79, %c0_80] : memref<4x8x8xbf16, #tpu.memory_space<vmem>>, vector<4x8x8xbf16>
      tpu.vector_store %arg19[%c0_78, %c0_79, %c0_80], %156 {strides = array<i32>} : memref<4x8x8xbf16, #tpu.memory_space<vmem>>, vector<4x8x8xbf16>,
      %158 = vector.extract_strided_slice %153 {offsets = [0, 32], sizes = [8, 32], strides = [1, 1]} : vector<8x64xbf16> to vector<8x32xbf16>
      %159 = vector.shape_cast %158 : vector<8x32xbf16> to vector<8x4x8xbf16>
      %160 = tpu.transpose %159, [1, 0, 2] : vector<8x4x8xbf16> -> vector<4x8x8xbf16>
      %c0_81 = arith.constant 0 : index
      %c0_82 = arith.constant 0 : index
      %c0_83 = arith.constant 0 : index
      %161 = vector.load %arg20[%c0_81, %c0_82, %c0_83] : memref<4x8x8xbf16, #tpu.memory_space<vmem>>, vector<4x8x8xbf16>
      tpu.vector_store %arg20[%c0_81, %c0_82, %c0_83], %160 {strides = array<i32>} : memref<4x8x8xbf16, #tpu.memory_space<vmem>>, vector<4x8x8xbf16>,
    } else {
    }
    %c8_i32 = arith.constant 8 : i32
    %3 = arith.muli %arg1, %c8_i32 : i32
    %4 = tpu.assume_multiple %3, 8 : i32
    %c0 = arith.constant 0 : index
    %5 = arith.index_cast %4 : i32 to index
    %c0_1 = arith.constant 0 : index
    %6 = vector.load %arg2[%c0, %5, %c0_1] : memref<1x8x32xf32, #tpu.memory_space<vmem>>, vector<1x8x32xf32>
    %7 = vector.shape_cast %6 : vector<1x8x32xf32> to vector<8x32xf32>
    %8 = arith.truncf %7 : vector<8x32xf32> to vector<8x32xbf16>
    %c0_2 = arith.constant 0 : index
    %c0_3 = arith.constant 0 : index
    %9 = vector.load %arg4[%c0_2, %c0_3] : memref<32x32xbf16, #tpu.memory_space<vmem>>, vector<32x32xbf16>
    %cst = arith.constant dense<0.000000e+00> : vector<8x32xf32>
    %10 = tpu.matmul %8, %9, %cst {dimension_numbers = #tpu.dot_dimension_numbers<[1], [0], [0], [1], [0, 0, 1, 1], [], []>} : vector<8x32xbf16>, vector<32x32xbf16>, vector<8x32xf32> -> vector<8x32xf32>
    %c0_4 = arith.constant 0 : index
    %c0_5 = arith.constant 0 : index
    %11 = vector.load %arg5[%c0_4, %c0_5] : memref<1x32xf32, #tpu.memory_space<vmem>>, vector<1x32xf32>
    %12 = vector.broadcast %11 : vector<1x32xf32> to vector<8x32xf32>
    %13 = arith.addf %10, %12 : vector<8x32xf32>
    %14 = arith.truncf %13 : vector<8x32xf32> to vector<8x32xbf16>
    %15 = vector.shape_cast %14 : vector<8x32xbf16> to vector<8x4x8xbf16>
    %16 = tpu.transpose %15, [1, 0, 2] : vector<8x4x8xbf16> -> vector<4x8x8xbf16>
    %c0_6 = arith.constant 0 : index
    %c0_7 = arith.constant 0 : index
    %c0_8 = arith.constant 0 : index
    %17 = vector.load %arg19[%c0_6, %c0_7, %c0_8] : memref<4x8x8xbf16, #tpu.memory_space<vmem>>, vector<4x8x8xbf16>
    %c0_9 = arith.constant 0 : index
    %c0_10 = arith.constant 0 : index
    %c0_11 = arith.constant 0 : index
    %18 = vector.load %arg20[%c0_9, %c0_10, %c0_11] : memref<4x8x8xbf16, #tpu.memory_space<vmem>>, vector<4x8x8xbf16>
    "tpu.trace_start"() <{level = 10 : i32, message = "hqd,hkd->hqk"}> : () -> ()
    %cst_12 = arith.constant dense<0.000000e+00> : vector<4x8x8xf32>
    %19 = tpu.matmul %16, %17, %cst_12 {dimension_numbers = #tpu.dot_dimension_numbers<[2], [2], [1], [1], [0, 0, 0, 1, 1, 1], [0], [0]>} : vector<4x8x8xbf16>, vector<4x8x8xbf16>, vector<4x8x8xf32> -> vector<4x8x8xf32>
    "tpu.trace_stop"() : () -> ()
    %c0_13 = arith.constant 0 : index
    %c0_14 = arith.constant 0 : index
    %c0_15 = arith.constant 0 : index
    %20 = vector.load %arg3[%c0_13, %c0_14, %c0_15] : memref<1x1x8xf32, #tpu.memory_space<vmem>>, vector<1x1x8xf32>
    %21 = vector.broadcast %20 : vector<1x1x8xf32> to vector<4x8x8xf32>
    %22 = arith.addf %19, %21 : vector<4x8x8xf32>
    %cst_16 = arith.constant dense<0xFF800000> : vector<4x8xf32>
    %23 = vector.multi_reduction <maximumf>, %22, %cst_16 [2] : vector<4x8x8xf32> to vector<4x8xf32>
    %24 = vector.shape_cast %23 : vector<4x8xf32> to vector<4x8x1xf32>
    %25 = vector.broadcast %24 : vector<4x8x1xf32> to vector<4x8x8xf32>
    %26 = arith.subf %22, %25 : vector<4x8x8xf32>
    %27 = math.exp %26 : vector<4x8x8xf32>
    %cst_17 = arith.constant dense<0.000000e+00> : vector<4x8xf32>
    %28 = vector.multi_reduction <add>, %27, %cst_17 [2] : vector<4x8x8xf32> to vector<4x8xf32>
    %29 = vector.shape_cast %28 : vector<4x8xf32> to vector<4x8x1xf32>
    %30 = tpu.reciprocal %29 {approx = true} : vector<4x8x1xf32> -> vector<4x8x1xf32>
    %31 = vector.broadcast %30 : vector<4x8x1xf32> to vector<4x8x8xf32>
    %32 = arith.mulf %27, %31 : vector<4x8x8xf32>
    %33 = arith.truncf %32 : vector<4x8x8xf32> to vector<4x8x8xbf16>
    "tpu.trace_start"() <{level = 10 : i32, message = "hqk,hkd->hqd"}> : () -> ()
    %cst_18 = arith.constant dense<0.000000e+00> : vector<4x8x8xf32>
    %34 = tpu.matmul %33, %18, %cst_18 {dimension_numbers = #tpu.dot_dimension_numbers<[2], [1], [1], [2], [0, 0, 0, 1, 1, 2], [0], [0]>} : vector<4x8x8xbf16>, vector<4x8x8xbf16>, vector<4x8x8xf32> -> vector<4x8x8xf32>
    "tpu.trace_stop"() : () -> ()
    %35 = tpu.transpose %34, [1, 0, 2] : vector<4x8x8xf32> -> vector<8x4x8xf32>
    %36 = vector.shape_cast %35 : vector<8x4x8xf32> to vector<8x32xf32>
    %37 = arith.truncf %36 : vector<8x32xf32> to vector<8x32xbf16>
    %c0_19 = arith.constant 0 : index
    %c0_20 = arith.constant 0 : index
    %38 = vector.load %arg8[%c0_19, %c0_20] : memref<32x32xbf16, #tpu.memory_space<vmem>>, vector<32x32xbf16>
    %cst_21 = arith.constant dense<0.000000e+00> : vector<8x32xf32>
    %39 = tpu.matmul %37, %38, %cst_21 {dimension_numbers = #tpu.dot_dimension_numbers<[1], [0], [0], [1], [0, 0, 1, 1], [], []>} : vector<8x32xbf16>, vector<32x32xbf16>, vector<8x32xf32> -> vector<8x32xf32>
    %c0_22 = arith.constant 0 : index
    %c0_23 = arith.constant 0 : index
    %40 = vector.load %arg9[%c0_22, %c0_23] : memref<1x32xf32, #tpu.memory_space<vmem>>, vector<1x32xf32>
    %41 = vector.broadcast %40 : vector<1x32xf32> to vector<8x32xf32>
    %42 = arith.addf %39, %41 : vector<8x32xf32>
    %43 = arith.addf %42, %7 : vector<8x32xf32>
    %c0_24 = arith.constant 0 : index
    %c0_25 = arith.constant 0 : index
    %44 = vector.load %arg10[%c0_24, %c0_25] : memref<1x32xf32, #tpu.memory_space<vmem>>, vector<1x32xf32>
    %c0_26 = arith.constant 0 : index
    %c0_27 = arith.constant 0 : index
    %45 = vector.load %arg11[%c0_26, %c0_27] : memref<1x32xf32, #tpu.memory_space<vmem>>, vector<1x32xf32>
    %cst_28 = arith.constant dense<0.000000e+00> : vector<8xf32>
    %46 = vector.multi_reduction <add>, %43, %cst_28 [1] : vector<8x32xf32> to vector<8xf32>
    %47 = vector.shape_cast %46 : vector<8xf32> to vector<8x1xf32>
    %cst_29 = arith.constant 3.200000e+01 : f32
    %48 = vector.broadcast %cst_29 : f32 to vector<8x1xf32>
    %49 = arith.divf %47, %48 : vector<8x1xf32>
    %50 = vector.broadcast %49 : vector<8x1xf32> to vector<8x32xf32>
    %51 = arith.subf %43, %50 : vector<8x32xf32>
    %52 = arith.mulf %51, %51 : vector<8x32xf32>
    %cst_30 = arith.constant dense<0.000000e+00> : vector<8xf32>
    %53 = vector.multi_reduction <add>, %52, %cst_30 [1] : vector<8x32xf32> to vector<8xf32>
    %54 = vector.shape_cast %53 : vector<8xf32> to vector<8x1xf32>
    %cst_31 = arith.constant 3.200000e+01 : f32
    %55 = vector.broadcast %cst_31 : f32 to vector<8x1xf32>
    %56 = arith.divf %54, %55 : vector<8x1xf32>
    %cst_32 = arith.constant 9.99999996E-13 : f32
    %57 = vector.broadcast %cst_32 : f32 to vector<8x1xf32>
    %58 = arith.addf %56, %57 : vector<8x1xf32>
    %59 = math.rsqrt %58 : vector<8x1xf32>
    %60 = vector.broadcast %59 : vector<8x1xf32> to vector<8x32xf32>
    %61 = arith.mulf %51, %60 : vector<8x32xf32>
    %62 = vector.broadcast %44 : vector<1x32xf32> to vector<8x32xf32>
    %63 = arith.mulf %61, %62 : vector<8x32xf32>
    %64 = vector.broadcast %45 : vector<1x32xf32> to vector<8x32xf32>
    %65 = arith.addf %63, %64 : vector<8x32xf32>
    %66 = arith.truncf %65 : vector<8x32xf32> to vector<8x32xbf16>
    %cst_33 = arith.constant 0.000000e+00 : f32
    %67 = vector.broadcast %cst_33 : f32 to vector<8x32xf32>
    %c0_34 = arith.constant 0 : index
    %c0_35 = arith.constant 0 : index
    %68 = vector.load %arg15[%c0_34, %c0_35] : memref<1x32xf32, #tpu.memory_space<vmem>>, vector<1x32xf32>
    %69 = vector.broadcast %68 : vector<1x32xf32> to vector<8x32xf32>
    %70 = arith.addf %67, %69 : vector<8x32xf32>
    %c0_36 = arith.constant 0 : index
    %c0_37 = arith.constant 0 : index
    %71 = vector.load %arg12[%c0_36, %c0_37] : memref<32x128xbf16, #tpu.memory_space<vmem>>, vector<32x128xbf16>
    %cst_38 = arith.constant dense<0.000000e+00> : vector<8x128xf32>
    %72 = tpu.matmul %66, %71, %cst_38 {dimension_numbers = #tpu.dot_dimension_numbers<[1], [0], [0], [1], [0, 0, 1, 1], [], []>} : vector<8x32xbf16>, vector<32x128xbf16>, vector<8x128xf32> -> vector<8x128xf32>
    %c0_39 = arith.constant 0 : index
    %c0_40 = arith.constant 0 : index
    %73 = vector.load %arg13[%c0_39, %c0_40] : memref<1x128xf32, #tpu.memory_space<vmem>>, vector<1x128xf32>
    %74 = vector.broadcast %73 : vector<1x128xf32> to vector<8x128xf32>
    %75 = arith.addf %72, %74 : vector<8x128xf32>
    %cst_41 = arith.constant 5.000000e-01 : f32
    %76 = vector.broadcast %cst_41 : f32 to vector<8x128xf32>
    %77 = arith.mulf %75, %76 : vector<8x128xf32>
    %cst_42 = arith.constant 0.707106769 : f32
    %78 = vector.broadcast %cst_42 : f32 to vector<8x128xf32>
    %79 = arith.mulf %75, %78 : vector<8x128xf32>
    %80 = math.absf %79 : vector<8x128xf32>
    %cst_43 = arith.constant 0.327591091 : f32
    %81 = vector.broadcast %cst_43 : f32 to vector<8x128xf32>
    %82 = arith.mulf %81, %80 : vector<8x128xf32>
    %cst_44 = arith.constant 1.000000e+00 : f32
    %83 = vector.broadcast %cst_44 : f32 to vector<8x128xf32>
    %84 = arith.addf %83, %82 : vector<8x128xf32>
    %85 = tpu.reciprocal %84 {approx = true} : vector<8x128xf32> -> vector<8x128xf32>
    %cst_45 = arith.constant 1.06140542 : f32
    %86 = vector.broadcast %cst_45 : f32 to vector<8x128xf32>
    %87 = arith.mulf %86, %85 : vector<8x128xf32>
    %cst_46 = arith.constant -1.45315206 : f32
    %88 = vector.broadcast %cst_46 : f32 to vector<8x128xf32>
    %89 = arith.addf %87, %88 : vector<8x128xf32>
    %90 = arith.mulf %89, %85 : vector<8x128xf32>
    %cst_47 = arith.constant 1.42141378 : f32
    %91 = vector.broadcast %cst_47 : f32 to vector<8x128xf32>
    %92 = arith.addf %90, %91 : vector<8x128xf32>
    %93 = arith.mulf %92, %85 : vector<8x128xf32>
    %cst_48 = arith.constant -0.284496725 : f32
    %94 = vector.broadcast %cst_48 : f32 to vector<8x128xf32>
    %95 = arith.addf %93, %94 : vector<8x128xf32>
    %96 = arith.mulf %95, %85 : vector<8x128xf32>
    %cst_49 = arith.constant 0.254829586 : f32
    %97 = vector.broadcast %cst_49 : f32 to vector<8x128xf32>
    %98 = arith.addf %96, %97 : vector<8x128xf32>
    %99 = arith.mulf %98, %85 : vector<8x128xf32>
    %cst_50 = arith.constant 0.000000e+00 : f32
    %100 = vector.broadcast %cst_50 : f32 to vector<8x128xf32>
    %101 = arith.subf %100, %80 : vector<8x128xf32>
    %102 = arith.mulf %101, %80 : vector<8x128xf32>
    %103 = math.exp %102 : vector<8x128xf32>
    %104 = arith.mulf %99, %103 : vector<8x128xf32>
    %cst_51 = arith.constant 1.000000e+00 : f32
    %105 = vector.broadcast %cst_51 : f32 to vector<8x128xf32>
    %106 = arith.subf %105, %104 : vector<8x128xf32>
    %cst_52 = arith.constant 0.000000e+00 : f32
    %107 = vector.broadcast %cst_52 : f32 to vector<8x128xf32>
    %108 = arith.cmpf olt, %79, %107 : vector<8x128xf32>
    %cst_53 = arith.constant 0.000000e+00 : f32
    %109 = vector.broadcast %cst_53 : f32 to vector<8x128xf32>
    %110 = arith.subf %109, %106 : vector<8x128xf32>
    %111 = arith.select %108, %110, %106 : vector<8x128xi1>, vector<8x128xf32>
    %cst_54 = arith.constant 1.000000e+00 : f32
    %112 = vector.broadcast %cst_54 : f32 to vector<8x128xf32>
    %113 = arith.addf %112, %111 : vector<8x128xf32>
    %114 = arith.mulf %77, %113 : vector<8x128xf32>
    %115 = arith.truncf %114 : vector<8x128xf32> to vector<8x128xbf16>
    %c0_55 = arith.constant 0 : index
    %c0_56 = arith.constant 0 : index
    %116 = vector.load %arg14[%c0_55, %c0_56] : memref<128x32xbf16, #tpu.memory_space<vmem>>, vector<128x32xbf16>
    %cst_57 = arith.constant dense<0.000000e+00> : vector<8x32xf32>
    %117 = tpu.matmul %115, %116, %cst_57 {dimension_numbers = #tpu.dot_dimension_numbers<[1], [0], [0], [1], [0, 0, 1, 1], [], []>} : vector<8x128xbf16>, vector<128x32xbf16>, vector<8x32xf32> -> vector<8x32xf32>
    %118 = arith.addf %70, %117 : vector<8x32xf32>
    %119 = arith.addf %118, %65 : vector<8x32xf32>
    %c0_58 = arith.constant 0 : index
    %c0_59 = arith.constant 0 : index
    %120 = vector.load %arg16[%c0_58, %c0_59] : memref<1x32xf32, #tpu.memory_space<vmem>>, vector<1x32xf32>
    %c0_60 = arith.constant 0 : index
    %c0_61 = arith.constant 0 : index
    %121 = vector.load %arg17[%c0_60, %c0_61] : memref<1x32xf32, #tpu.memory_space<vmem>>, vector<1x32xf32>
    %cst_62 = arith.constant dense<0.000000e+00> : vector<8xf32>
    %122 = vector.multi_reduction <add>, %119, %cst_62 [1] : vector<8x32xf32> to vector<8xf32>
    %123 = vector.shape_cast %122 : vector<8xf32> to vector<8x1xf32>
    %cst_63 = arith.constant 3.200000e+01 : f32
    %124 = vector.broadcast %cst_63 : f32 to vector<8x1xf32>
    %125 = arith.divf %123, %124 : vector<8x1xf32>
    %126 = vector.broadcast %125 : vector<8x1xf32> to vector<8x32xf32>
    %127 = arith.subf %119, %126 : vector<8x32xf32>
    %128 = arith.mulf %127, %127 : vector<8x32xf32>
    %cst_64 = arith.constant dense<0.000000e+00> : vector<8xf32>
    %129 = vector.multi_reduction <add>, %128, %cst_64 [1] : vector<8x32xf32> to vector<8xf32>
    %130 = vector.shape_cast %129 : vector<8xf32> to vector<8x1xf32>
    %cst_65 = arith.constant 3.200000e+01 : f32
    %131 = vector.broadcast %cst_65 : f32 to vector<8x1xf32>
    %132 = arith.divf %130, %131 : vector<8x1xf32>
    %cst_66 = arith.constant 9.99999996E-13 : f32
    %133 = vector.broadcast %cst_66 : f32 to vector<8x1xf32>
    %134 = arith.addf %132, %133 : vector<8x1xf32>
    %135 = math.rsqrt %134 : vector<8x1xf32>
    %136 = vector.broadcast %135 : vector<8x1xf32> to vector<8x32xf32>
    %137 = arith.mulf %127, %136 : vector<8x32xf32>
    %138 = vector.broadcast %120 : vector<1x32xf32> to vector<8x32xf32>
    %139 = arith.mulf %137, %138 : vector<8x32xf32>
    %140 = vector.broadcast %121 : vector<1x32xf32> to vector<8x32xf32>
    %141 = arith.addf %139, %140 : vector<8x32xf32>
    %c0_67 = arith.constant 0 : index
    %c0_68 = arith.constant 0 : index
    %c0_69 = arith.constant 0 : index
    %142 = vector.load %arg18[%c0_67, %c0_68, %c0_69] : memref<1x8x32xf32, #tpu.memory_space<vmem>>, vector<1x8x32xf32>
    %143 = vector.shape_cast %142 : vector<1x8x32xf32> to vector<8x32xf32>
    %144 = vector.shape_cast %141 : vector<8x32xf32> to vector<1x8x32xf32>
    tpu.vector_store %arg18[%c0_67, %c0_68, %c0_69], %144 {strides = array<i32>} : memref<1x8x32xf32, #tpu.memory_space<vmem>>, vector<1x8x32xf32>,
    return
  }
  func.func @transform_0(%arg0: i32, %arg1: i32) -> (i32, i32, i32) {
    %c0_i32 = arith.constant 0 : i32
    %c0_i32_0 = arith.constant 0 : i32
    %c0_i32_1 = arith.constant 0 : i32
    return %arg0, %c0_i32, %c0_i32_0 : i32, i32, i32
  }
  func.func @transform_1(%arg0: i32, %arg1: i32) -> (i32, i32, i32) {
    %c0_i32 = arith.constant 0 : i32
    %c0_i32_0 = arith.constant 0 : i32
    %c0_i32_1 = arith.constant 0 : i32
    return %arg0, %c0_i32, %c0_i32_0 : i32, i32, i32
  }
  func.func @transform_2(%arg0: i32, %arg1: i32) -> (i32, i32) {
    %c0_i32 = arith.constant 0 : i32
    %c0_i32_0 = arith.constant 0 : i32
    %c0_i32_1 = arith.constant 0 : i32
    return %c0_i32, %c0_i32_0 : i32, i32
  }
  func.func @transform_3(%arg0: i32, %arg1: i32) -> (i32, i32) {
    %c0_i32 = arith.constant 0 : i32
    %c0_i32_0 = arith.constant 0 : i32
    %c0_i32_1 = arith.constant 0 : i32
    return %c0_i32, %c0_i32_0 : i32, i32
  }
  func.func @transform_4(%arg0: i32, %arg1: i32) -> (i32, i32) {
    %c0_i32 = arith.constant 0 : i32
    %c0_i32_0 = arith.constant 0 : i32
    %c0_i32_1 = arith.constant 0 : i32
    return %c0_i32, %c0_i32_0 : i32, i32
  }
  func.func @transform_5(%arg0: i32, %arg1: i32) -> (i32, i32) {
    %c0_i32 = arith.constant 0 : i32
    %c0_i32_0 = arith.constant 0 : i32
    %c0_i32_1 = arith.constant 0 : i32
    return %c0_i32, %c0_i32_0 : i32, i32
  }
  func.func @transform_6(%arg0: i32, %arg1: i32) -> (i32, i32) {
    %c0_i32 = arith.constant 0 : i32
    %c0_i32_0 = arith.constant 0 : i32
    %c0_i32_1 = arith.constant 0 : i32
    return %c0_i32, %c0_i32_0 : i32, i32
  }
  func.func @transform_7(%arg0: i32, %arg1: i32) -> (i32, i32) {
    %c0_i32 = arith.constant 0 : i32
    %c0_i32_0 = arith.constant 0 : i32
    %c0_i32_1 = arith.constant 0 : i32
    return %c0_i32, %c0_i32_0 : i32, i32
  }
  func.func @transform_8(%arg0: i32, %arg1: i32) -> (i32, i32) {
    %c0_i32 = arith.constant 0 : i32
    %c0_i32_0 = arith.constant 0 : i32
    %c0_i32_1 = arith.constant 0 : i32
    return %c0_i32, %c0_i32_0 : i32, i32
  }
  func.func @transform_9(%arg0: i32, %arg1: i32) -> (i32, i32) {
    %c0_i32 = arith.constant 0 : i32
    %c0_i32_0 = arith.constant 0 : i32
    %c0_i32_1 = arith.constant 0 : i32
    return %c0_i32, %c0_i32_0 : i32, i32
  }
  func.func @transform_10(%arg0: i32, %arg1: i32) -> (i32, i32) {
    %c0_i32 = arith.constant 0 : i32
    %c0_i32_0 = arith.constant 0 : i32
    %c0_i32_1 = arith.constant 0 : i32
    return %c0_i32, %c0_i32_0 : i32, i32
  }
  func.func @transform_11(%arg0: i32, %arg1: i32) -> (i32, i32) {
    %c0_i32 = arith.constant 0 : i32
    %c0_i32_0 = arith.constant 0 : i32
    %c0_i32_1 = arith.constant 0 : i32
    return %c0_i32, %c0_i32_0 : i32, i32
  }
  func.func @transform_12(%arg0: i32, %arg1: i32) -> (i32, i32) {
    %c0_i32 = arith.constant 0 : i32
    %c0_i32_0 = arith.constant 0 : i32
    %c0_i32_1 = arith.constant 0 : i32
    return %c0_i32, %c0_i32_0 : i32, i32
  }
  func.func @transform_13(%arg0: i32, %arg1: i32) -> (i32, i32) {
    %c0_i32 = arith.constant 0 : i32
    %c0_i32_0 = arith.constant 0 : i32
    %c0_i32_1 = arith.constant 0 : i32
    return %c0_i32, %c0_i32_0 : i32, i32
  }
  func.func @transform_14(%arg0: i32, %arg1: i32) -> (i32, i32) {
    %c0_i32 = arith.constant 0 : i32
    %c0_i32_0 = arith.constant 0 : i32
    %c0_i32_1 = arith.constant 0 : i32
    return %c0_i32, %c0_i32_0 : i32, i32
  }
  func.func @transform_15(%arg0: i32, %arg1: i32) -> (i32, i32) {
    %c0_i32 = arith.constant 0 : i32
    %c0_i32_0 = arith.constant 0 : i32
    %c0_i32_1 = arith.constant 0 : i32
    return %c0_i32, %c0_i32_0 : i32, i32
  }
  func.func @transform_16(%arg0: i32, %arg1: i32) -> (i32, i32, i32) {
    %c0_i32 = arith.constant 0 : i32
    %c0_i32_0 = arith.constant 0 : i32
    return %arg0, %arg1, %c0_i32 : i32, i32, i32
  }
}

</mosaic_0001>

<bundles_post_ra>
// kernel: tpu_custom_call.1
= control target key start
LH: loop header
LB: loop body
LE: loop exit
PB: predicated region body
PF: predicated region fallthrough
CT: control target
= control target key end

     0   :  { %s3115_s0 = inlined_call_operand.vmem [shape: f32[2,8,32], index: 0, kind: input, shape index: {}]   ;;  %s3116_s1 = inlined_call_operand.vmem [shape: f32[2,1,8], index: 1, kind: input, shape index: {}]   ;;  %s3117_s2 = inlined_call_operand.vmem [shape: bf16[32,32], index: 2, kind: input, shape index: {}]   ;;  %s3118_s3 = inlined_call_operand.vmem [shape: f32[1,32], index: 3, kind: input, shape index: {}]   ;;  %s3119_s4 = inlined_call_operand.vmem [shape: bf16[32,64], index: 4, kind: input, shape index: {}]   ;;  %s3120_s5 = inlined_call_operand.vmem [shape: f32[1,64], index: 5, kind: input, shape index: {}]   ;;  %s3121_s6 = inlined_call_operand.vmem [shape: bf16[32,32], index: 6, kind: input, shape index: {}]   ;;  %s3122_s7 = inlined_call_operand.vmem [shape: f32[1,32], index: 7, kind: input, shape index: {}]   ;;  %s3123_s8 = inlined_call_operand.vmem [shape: f32[1,32], index: 8, kind: input, shape index: {}]   ;;  %s3124_s9 = inlined_call_operand.vmem [shape: f32[1,32], index: 9, kind: input, shape index: {}]   ;;  %s3125_s10 = inlined_call_operand.vmem [shape: bf16[32,128], index: 10, kind: input, shape index: {}]   ;;  %s3126_s11 = inlined_call_operand.vmem [shape: f32[1,128], index: 11, kind: input, shape index: {}]   ;;  %s3127_s12 = inlined_call_operand.vmem [shape: bf16[128,32], index: 12, kind: input, shape index: {}]   ;;  %s3128_s13 = inlined_call_operand.vmem [shape: f32[1,32], index: 13, kind: input, shape index: {}]   ;;  %s3129_s14 = inlined_call_operand.vmem [shape: f32[1,32], index: 14, kind: input, shape index: {}]   ;;  %s3130_s15 = inlined_call_operand.vmem [shape: f32[1,32], index: 15, kind: input, shape index: {}]   ;;  %s3131_s16 = inlined_call_operand.hbm [shape: f32[2,8,32], index: 16, kind: output, shape index: {}]  }
   0x1   :  { %3135 = sst [smem:[#allocation11_spill]] %s3115_s0 }
   0x2   :  { %3136 = sst [smem:[#allocation12_spill]] %s3116_s1 }
   0x3   :  { %3137 = sst [smem:[#allocation13_spill]] %s3117_s2 }
   0x4   :  { %3138 = sst [smem:[#allocation14_spill]] %s3119_s4 }
   0x5   :  { %21 = vsyncpa [#allocation5], 0 }
   0x6   :  { %23 = vsyncpa [#allocation5 + $0x1], 0  ;;  %s2704_s21 = smov 0   ;;  %s2706_s22 = smov 0  }
   0x7   :  { %s2708_s23 = smov 0   ;;  %s2710_s24 = smov 0  }
   0x8   :  { %s2712_s25 = smov 0   ;;  %s2714_s26 = smov 0  }
   0x9 LB: > { %3139 = sst [smem:[#allocation7_spill]] %s2592_s23  ;;  %s2231_s27 = sadd.s32 4294967295, %s2604_s26   ;;  %s2604_s26 = sphi %s2714_s26, %s29_s26   ;;  %s2600_s25 = sphi %s2712_s25, %s3152_s25   ;;  %s2596_s24 = sphi %s2710_s24, %s3151_s24   ;;  %s2592_s23 = sphi %s2708_s23, %s3150_s23   ;;  %s2588_s22 = sphi %s2706_s22, %s3154_s22   ;;  %s2584_s21 = sphi %s2704_s21, %s3153_s21  }
   0xa   : > { %3140 = sst [smem:[#allocation8_spill]] %s2600_s25  ;;  %s2232_s28 = sadd.s32 4294967294, %s2604_s26  }
   0xb   : > { %s41_s29 = sadd.s32 1, %s2600_s25  ;;  %s396_s30 = sadd.s32 1, %s2592_s23 }
   0xc   : > { %p43_p0 = scmp.ge.s32.totalorder %s41_s29, 2  ;;  %p406_p1 = scmp.ne.s32.totalorder %s2592_s23, %s2588_s22 }
   0xd   : > { %p407_p2 = scmp.eq.s32.totalorder %s2231_s27, 1  ;;  %p412_p3 = scmp.ne.s32.totalorder %s2588_s22, %s2584_s21 }
   0xe   : > { %s3156_s29 = smov (%p43_p0, %s41_s29), 0  ;;  %p413_p5 = scmp.eq.s32.totalorder %s2232_s28, 1 }
   0xf   : > { %3141 = sst [smem:[#allocation9_spill]] %s3156_s29  ;;  %p2744_p4 = por %p407_p2, %p406_p1 }
  0x10   : > { %s391_s17 = ssub.s32 %s2600_s25, %s3156_s29  ;;  %p2235_p6 = scmp.ge.s32.totalorder %s2604_s26, 1 }
  0x11   : > { %p394_p7 = scmp.eq.s32.totalorder %s391_s17, 0  ;;  %p2751_p8 = por %p413_p5, %p412_p3 }
  0x12   : > { %p486_p9 = scmp.lt.s32.totalorder %s2604_s26, 3 }
  0x13   : > { %s2757_s19 = scalar_select %p394_p7, %s2592_s23, %s396_s30  }
  0x14   : > { %p487_p10 = pnand %p2235_p6, %p486_p9 }
  0x15   : > { %3144 = sst [smem:[#allocation10_spill]] %s2757_s19  ;;  %s3145_s4 = sld [smem:[#allocation14_spill]] (!%p487_p10)  ;;  %v2606_v1 = vmov (!%p487_p10), 0.0   ;;  %vm2607_vm0 = vmmov (!%p487_p10), 0   ;;  %vm575_vm1 = vcmask (!%p487_p10), 261120   ;;  %v630_v23 = vlaneseq (!%p487_p10) }
  0x16   : > { %490 = sbr.rel (%p487_p10) target bundleno = 2647 (0xa57), region = 84  ;;  %2319 = vmatprep.subr.bf16.mxu1 (!%p487_p10), %v2606_v1  ;;  %2347 = vmatprep.subr.bf16.mxu0 (!%p487_p10), %v2606_v1  ;;  %p538_p11 = scmp.lt.s32.totalorder (!%p487_p10), %s2596_s24, 1  ;;  %v2238_v7 = vld [vmem:[%s3120_s5] ss:$0 sm:$0xff] (!%p487_p10)  ;;  %v2611_v21 = vmov (!%p487_p10), 1983009808  }
  0x17   : > { %2323 = vmatprep.mubr.msk.bf16.mxu1 (!%p487_p10), %vm2607_vm0, %v2606_v1  ;;  %2349 = vmatprep.mubr.msk.bf16.mxu0 (!%p487_p10), %vm2607_vm0, %v2606_v1  ;;  %s3146_s2 = sld [smem:[#allocation13_spill]] (!%p487_p10)  ;;  %s2608_s23 = smov (!%p487_p10), 104   ;;  %v2242_v14 = vld [vmem:[%s3118_s3] ss:$0 sm:$0xff] (!%p487_p10)  ;;  %v628_v22 = vunpack.c.l.s4 (!%p487_p10), %v2611_v21  ;;  %v2612_v24 = vmov (!%p487_p10), 1934713408  }
  0x18   : > { %s2609_s29 = smov (!%p487_p10), 120   ;;  %s2610_s27 = smov (!%p487_p10), 112   ;;  %v645_v25 = vunpack.c.l.s4 (!%p487_p10), %v2612_v24  ;;  %v631_v27 = vshrl.u32 (!%p487_p10), %v630_v23, 7  ;;  %v2613_v42 = vmov (!%p487_p10), 0   ;;  %vm792_vm2 = vcmask (!%p487_p10), 60416  }
  0x19   : > { %v629_v26 = vunpack.c.0.s8 (!%p487_p10), %v628_v22  ;;  %vm1230_vm3 = vcmask (!%p487_p10), 64512   ;;  %s3148_s1 = sld [smem:[#allocation12_spill]] (!%p487_p10)  ;;  %vm1466_vm4 = vcmask (!%p487_p10), 1043456   ;;  %s2617_s28 = smov (!%p487_p10), 24   ;;  %vm1797_vm5 = vcmask (!%p487_p10), 130048  }
  0x1a   : > { %v646_v28 = vunpack.c.0.s8 (!%p487_p10), %v645_v25  ;;  %vm1799_vm6 = vcmask (!%p487_p10), 195584   ;;  %s535_s17 = sand.u32 (!%p487_p10), 1, %s2588_s22   ;;  %s2279_s19 = sshll.u32 (!%p487_p10), %s2596_s24, 7 }
  0x1b   : > { %v2486_v0 = vld [vmem:[%s3145_s4] sm:$0xff] (!%p487_p10)   ;;  %v2487_v2 = vld [vmem:[%s3145_s4 + $0x8] sm:$0xff] (!%p487_p10)   ;;  %s3147_s4 = sld [smem:[#allocation11_spill]] (!%p487_p10)  ;;  %v2810_v29 = vsub.s32 (!%p487_p10), %v629_v26, %v631_v27 }
  0x1c   : > { %2320 = vmatpush3.bf16.msra.mxu1 (!%p487_p10), %v2486_v0  ;;  %v2818_v33 = vsub.s32 (!%p487_p10), %v646_v28, %v631_v27 }
  0x1d   : > { %2321 = vmatprep.subr.bf16.mxu1 %v2606_v1  ;;  %s2774_s30 = scalar_select %p538_p11, %s2596_s24, 1  ;;  %v2488_v3 = vld [vmem:[%s3146_s2] sm:$0xff]   ;;  %v2489_v6 = vld [vmem:[%s3146_s2 + $0x8] sm:$0xff]  }
  0x1e   : > { %s3067_s2 = scalar_lea.hbm %s3131_s16, %s2279_s19  ;;  %s2618_s24 = smov [#allocation4]  }
  0x1f   : > { %s2237_s20 = sshll.u32 %s2774_s30, 3 }
  0x20   : > { %2322 = vmatpush3.bf16.msra.mxu1 %v2487_v2 }
  0x21   : > { %s541_s25 = scalar_lea.vmem %s3147_s4, %s2237_s20  ;;  %2327 = vmatprep.subr.bf16.mxu1 %v2606_v1  ;;  %s544_s4 = scalar_lea.vmem %s3148_s1, %s2774_s30 }
  0x22   : > { %v2784_v4 = vld [vmem:[%s541_s25] sm:$0xff]  ;;  %s2614_s30 = smov 96   ;;  %s2615_s20 = smov 16  }
  0x23   : > { %v551_v5 = vpack.c.bf16 %v2784_v4, %v2784_v4 }
  0x25   : > { %2324 = vmatmul.mubr.msk.bf16.vlgmr.msra.gmra.mrb[0].mxu1 %vm575_vm1, %v551_v5 }
  0x26   : > { %2328 = vmatpush3.bf16.msra.mxu1 %v2488_v3  ;;  %2331 = vmatprep.mubr.msk.bf16.mxu1 %vm2607_vm0, %v2606_v1 }
  0x27   : > { %2329 = vmatprep.subr.bf16.mxu1 %v2606_v1 }
  0x2a   : > { %2330 = vmatpush3.bf16.msra.mxu1 %v2489_v6 }
  0x2b   : > { %2335 = vmatprep.subr.bf16.mxu1 %v2606_v1 }
  0x2d   : > { %2332 = vmatmul.mubr.msk.bf16.vlgmr.msra.gmra.mrb[4].mxu1 %vm575_vm1, %v551_v5 }
  0x2e   : > { %2337 = vmatprep.mubr.msk.bf16.mxu1 %vm2607_vm0, %v2606_v1 }
  0xf8   : > { %v613_v8 = vpop.f32.mrb[0].mxu1 }
  0xf9   : > { %v614_v9 = vadd.f32 %v2238_v7, %v613_v8  ;;  %v2325_v10 = vpop.f32.mrb[1].mxu1 }
  0xfa   : > { %v616_v11 = vpop.f32.mrb[2].mxu1 }
  0xfb   : > { %v2802_v12 = vpack.c.bf16 %v614_v9, %v614_v9  ;;  %v2326_v13 = vpop.f32.mrb[3].mxu1 }
  0xfd   : > { %625 = vrot.lane.b32.xlu1 %v2802_v12, %s2608_s23  ;;  %621 = vrot.lane.b32.xlu0 %v2802_v12, %s2609_s29  ;;  %v633_v41 = vrot.slane %v2802_v12, %v2810_v29 }
 0x100   : > { %v1040_v15 = vpop.f32.mrb[4].mxu1 }
 0x101   : > { %v1041_v16 = vadd.f32 %v2242_v14, %v1040_v15  ;;  %623 = vrot.lane.b32.xlu0 %v2802_v12, %s2610_s27  ;;  %v2333_v17 = vpop.f32.mrb[5].mxu1 }
 0x102   : > { %v1043_v18 = vpop.f32.mrb[6].mxu1 }
 0x103   : > { %v1046_v19 = vpack.c.bf16 %v1041_v16, %v1041_v16  ;;  %v2334_v20 = vpop.f32.mrb[7].mxu1 }
 0x105   : > { %1050 = vrot.lane.b32.xlu0 %v1046_v19, %s2610_s27  ;;  %1048 = vrot.lane.b32.xlu1 %v1046_v19, %s2609_s29  ;;  %v1060_v48 = vrot.slane %v1046_v19, %v2810_v29  ;;  %s2616_s27 = smov 8  }
 0x109   : > { %1052 = vrot.lane.b32.xlu1 %v1046_v19, %s2608_s23 }
 0x16f   : > { %v2812_v30 = vpop.permute.xlu1 %625  ;;  %v2814_v31 = vpop.permute.xlu0 %621 }
 0x170   : > { %v675_v32 = vrot.slane %v2812_v30, %v2810_v29  ;;  %v667_v34 = vrot.slane %v2814_v31, %v2810_v29 }
 0x172   : > { %v676_v35 = vcombine.low %v667_v34, %v675_v32  ;;  %v677_v36 = vcombine.high %v667_v34, %v675_v32 }
 0x173   : > { %v2822_v37 = vpop.permute.xlu0 %623 }
 0x174   : > { %v684_v38 = vrot.slane %v676_v35, %v2818_v33  ;;  %v691_v39 = vrot.slane %v677_v36, %v2818_v33  ;;  %v641_v40 = vrot.slane %v2822_v37, %v2810_v29 }
 0x176   : > { %v692_v43 = vcombine.high %v684_v38, %v2613_v42  ;;  %v642_v44 = vcombine.low %v633_v41, %v641_v40  ;;  %v643_v45 = vcombine.high %v633_v41, %v641_v40  ;;  %v693_v47 = vcombine.high %v691_v39, %v2613_v42 }
 0x177   : > { %v1051_v46 = vpop.permute.xlu0 %1050  ;;  %v1049_v50 = vpop.permute.xlu1 %1048  ;;  %v699_v51 = vshrl.u32 %v684_v38, 16  ;;  %v715_v55 = vshrl.u32 %v691_v39, 16 }
 0x178   : > { %v1068_v49 = vrot.slane %v1051_v46, %v2810_v29  ;;  %v650_v52 = vrot.slane %v642_v44, %v2818_v33  ;;  %v657_v53 = vrot.slane %v643_v45, %v2818_v33  ;;  %v707_v54 = vshrl.u32 %v692_v43, 16 }
 0x179   : > { %v723_v62 = vshrl.u32 %v693_v47, 16  ;;  %v1094_v16 = vrot.slane %v1049_v50, %v2810_v29 }
 0x17a   : > { %v1069_v56 = vcombine.low %v1060_v48, %v1068_v49  ;;  %v1070_v57 = vcombine.high %v1060_v48, %v1068_v49  ;;  %v658_v58 = vcombine.high %v650_v52, %v2613_v42  ;;  %v659_v59 = vcombine.high %v657_v53, %v2613_v42 }
 0x17b   : > { %v696_v60 = vpack.i.b16 %v684_v38, %v650_v52  ;;  %v698_v61 = vshrl.u32 %v650_v52, 16  ;;  %v712_v63 = vpack.i.b16 %v691_v39, %v657_v53  ;;  %v714_v0 = vshrl.u32 %v657_v53, 16  ;;  %v1053_v13 = vpop.permute.xlu1 %1052 }
 0x17c   : > { %v1077_v2 = vrot.slane %v1069_v56, %v2818_v33  ;;  %v704_v5 = vpack.i.b16 %v692_v43, %v658_v58  ;;  %v706_v6 = vshrl.u32 %v658_v58, 16  ;;  %v720_v7 = vpack.i.b16 %v693_v47, %v659_v59 }
 0x17d   : > { %v700_v3 = vpack.i.b16 %v699_v51, %v698_v61  ;;  %v716_v8 = vpack.i.b16 %v715_v55, %v714_v0  ;;  %v722_v9 = vshrl.u32 %v659_v59, 16  ;;  %v726_v10 = vcombine.low %v696_v60, %v712_v63 }
 0x17e   : > { %v1084_v11 = vrot.slane %v1070_v57, %v2818_v33  ;;  %v708_v14 = vpack.i.b16 %v707_v54, %v706_v6  ;;  %v734_v15 = vcombine.low %v704_v5, %v720_v7  ;;  %v1102_v21 = vrot.slane %v1053_v13, %v2810_v29 }
 0x17f   : > { %v724_v17 = vpack.i.b16 %v723_v62, %v722_v9  ;;  %v751_v18 = vcombine.low %v700_v3, %v716_v8  ;;  %v733_v19 = vrot.slane %v726_v10, %v2810_v29  ;;  %v1085_v23 = vcombine.high %v1077_v2, %v2613_v42 }
 0x180   : > { %v741_v20 = vrot.slane %v734_v15, %v2810_v29  ;;  %v1086_v24 = vcombine.high %v1084_v11, %v2613_v42  ;;  %v1103_v26 = vcombine.low %v1094_v16, %v1102_v21  ;;  %v1104_v27 = vcombine.high %v1094_v16, %v1102_v21 }
 0x181   : > { %v759_v22 = vcombine.low %v708_v14, %v724_v17  ;;  %v758_v28 = vrot.slane %v751_v18, %v2810_v29  ;;  %v1125_v35 = vshrl.u32 %v1077_v2, 16  ;;  %v1133_v40 = vshrl.u32 %v1085_v23, 16 }
 0x182   : > { %v742_v25 = vcombine.low %v733_v19, %v741_v20  ;;  %v1111_v36 = vrot.slane %v1103_v26, %v2818_v33  ;;  %v1118_v38 = vrot.slane %v1104_v27, %v2818_v33  ;;  %v1141_v41 = vshrl.u32 %v1084_v11, 16 }
 0x183   : > { %v766_v32 = vrot.slane %v759_v22, %v2810_v29  ;;  %v1149_v43 = vshrl.u32 %v1086_v24, 16 }
 0x184   : > { %v749_v34 = vrot.slane %v742_v25, %v2818_v33  ;;  %v1119_v46 = vcombine.high %v1111_v36, %v2613_v42  ;;  %v1120_v47 = vcombine.high %v1118_v38, %v2613_v42  ;;  %v1123_v49 = vpack.i.b16 %v1111_v36, %v1077_v2 }
 0x185   : > { %v767_v39 = vcombine.low %v758_v28, %v766_v32  ;;  %v1126_v50 = vshrl.u32 %v1111_v36, 16  ;;  %v1139_v51 = vpack.i.b16 %v1118_v38, %v1084_v11  ;;  %v1142_v55 = vshrl.u32 %v1118_v38, 16 }
 0x186   : > { %v750_v44 = vcombine.high %v749_v34, %v2613_v42  ;;  %v780_v45 = vshrl.u32 %v749_v34, 16  ;;  %v1131_v53 = vpack.i.b16 %v1119_v46, %v1085_v23  ;;  %v1134_v54 = vshrl.u32 %v1119_v46, 16 }
 0x187   : > { %v774_v48 = vrot.slane %v767_v39, %v2818_v33  ;;  %v1127_v59 = vpack.i.b16 %v1126_v50, %v1125_v35  ;;  %v1143_v61 = vpack.i.b16 %v1142_v55, %v1141_v41  ;;  %v1147_v62 = vpack.i.b16 %v1120_v47, %v1086_v24 }
 0x188   : > { %v788_v52 = vshrl.u32 %v750_v44, 16  ;;  %v1135_v60 = vpack.i.b16 %v1134_v54, %v1133_v40  ;;  %v1150_v63 = vshrl.u32 %v1120_v47, 16  ;;  %v1153_v2 = vcombine.low %v1123_v49, %v1139_v51 }
 0x189   : > { %v775_v56 = vcombine.high %v774_v48, %v2613_v42  ;;  %v778_v57 = vpack.i.b16 %v774_v48, %v749_v34  ;;  %v781_v58 = vshrl.u32 %v774_v48, 16  ;;  %v1161_v7 = vcombine.low %v1131_v53, %v1147_v62 }
 0x18a   : > { %v1151_v6 = vpack.i.b16 %v1150_v63, %v1149_v43  ;;  %v1178_v8 = vcombine.low %v1127_v59, %v1143_v61  ;;  %v1160_v13 = vrot.slane %v1153_v2, %v2810_v29 }
 0x18b   : > { %v782_v0 = vpack.i.b16 %v781_v58, %v780_v45  ;;  %v786_v3 = vpack.i.b16 %v775_v56, %v750_v44  ;;  %v789_v5 = vshrl.u32 %v775_v56, 16  ;;  %793 = vst.msk [vmem:[#allocation2] sm:$0xf] %vm792_vm2, %v778_v57  ;;  %v1168_v10 = vrot.slane %v1161_v7, %v2810_v29  ;;  %v2246_v44 = vld [vmem:[%s544_s4] ss:$0 sm:$0xff]  ;;  %s2236_s4 = sshll.u32 %s535_s17, 3 }
 0x18c   : > { %v1186_v11 = vcombine.low %v1135_v60, %v1151_v6  ;;  %v1185_v14 = vrot.slane %v1178_v8, %v2810_v29 }
 0x18d   : > { %v790_v9 = vpack.i.b16 %v789_v5, %v788_v52  ;;  %794 = vst.msk [vmem:[#allocation2 + $0x4] sm:$0xf] %vm792_vm2, %v782_v0  ;;  %795 = vst.msk [vmem:[#allocation2 + $0x8] sm:$0xf] %vm792_vm2, %v786_v3  ;;  %v1169_v16 = vcombine.low %v1160_v13, %v1168_v10 }
 0x18e   : > { %v1193_v15 = vrot.slane %v1186_v11, %v2810_v29 }
 0x18f   : > { %796 = vst.msk [vmem:[#allocation2 + $0xc] sm:$0xf] %vm792_vm2, %v790_v9  ;;  %v1176_v23 = vrot.slane %v1169_v16, %v2818_v33 }
 0x190   : > { %v1194_v17 = vcombine.low %v1185_v14, %v1193_v15 }
 0x191   : > { %v1177_v27 = vcombine.high %v1176_v23, %v2613_v42  ;;  %v1206_v35 = vshrl.u32 %v1176_v23, 16 }
 0x192   : > { %v1215_v18 = vld [vmem:[#allocation2] sm:$0xf]  ;;  %v1201_v21 = vrot.slane %v1194_v17, %v2818_v33 }
 0x193   : > { %v1235_v19 = vsel %vm1230_vm3, %v1215_v18, 0  ;;  %v1212_v41 = vshrl.u32 %v1177_v27, 16 }
 0x194   : > { %2336 = vmatpush3.bf16.xpose.msra.mxu1 %v1235_v19  ;;  %v1217_v20 = vld [vmem:[#allocation2 + $0x8] sm:$0xf]  ;;  %v1202_v24 = vcombine.high %v1201_v21, %v2613_v42  ;;  %v1216_v25 = vld [vmem:[#allocation2 + $0x4] sm:$0xf]  ;;  %v1205_v26 = vpack.i.b16 %v1201_v21, %v1176_v23  ;;  %v1207_v34 = vshrl.u32 %v1201_v21, 16 }
 0x195   : > { %v1327_v22 = vsel %vm1230_vm3, %v1217_v20, 0  ;;  %2341 = vmatprep.subr.bf16.mxu1 %v2606_v1  ;;  %v1281_v28 = vsel %vm1230_vm3, %v1216_v25, 0 }
 0x196   : > { %2348 = vmatpush3.bf16.xpose.msra.mxu0 %v1327_v22  ;;  %v1211_v32 = vpack.i.b16 %v1202_v24, %v1177_v27  ;;  %v1218_v36 = vld [vmem:[#allocation2 + $0xc] sm:$0xf]  ;;  %v1208_v38 = vpack.i.b16 %v1207_v34, %v1206_v35  ;;  %v1213_v40 = vshrl.u32 %v1202_v24, 16 }
 0x197   : > { %2359 = vmatprep.subr.bf16.mxu0 %v2606_v1  ;;  %v1373_v39 = vsel %vm1230_vm3, %v1218_v36, 0 }
 0x198   : > { %v1214_v43 = vpack.i.b16 %v1213_v40, %v1212_v41 }
 0x19b   : > { %2338 = vmatmul.mubr.msk.bf16.vlgmr.msra.gmra.mrb[8].mxu1 %vm1230_vm3, %v1205_v26 }
 0x19c   : > { %2342 = vmatpush3.bf16.xpose.msra.mxu1 %v1281_v28  ;;  %2343 = vmatprep.mubr.msk.bf16.mxu1 %vm2607_vm0, %v2606_v1 }
 0x19d   : > { %2350 = vmatmul.mubr.msk.bf16.vlgmr.msra.gmra.mrb[0].mxu0 %vm1230_vm3, %v1211_v32  ;;  %2353 = vmatprep.subr.bf16.mxu1 %v2606_v1 }
 0x19e   : > { %2361 = vmatprep.mubr.msk.bf16.mxu0 %vm2607_vm0, %v2606_v1 }
 0x1a3   : > { %2344 = vmatmul.mubr.msk.bf16.vlgmr.msra.gmra.mrb[12].mxu1 %vm1230_vm3, %v1208_v38 }
 0x1a4   : > { %2354 = vmatpush3.bf16.xpose.msra.mxu1 %v1373_v39  ;;  %2355 = vmatprep.mubr.msk.bf16.mxu1 %vm2607_vm0, %v2606_v1 }
 0x1a5   : > { %2365 = vmatprep.subr.bf16.mxu1 %v2606_v1 }
 0x1ab   : > { %2356 = vmatmul.mubr.msk.bf16.vlgmr.msra.gmra.mrb[16].mxu1 %vm1230_vm3, %v1214_v43 }
 0x1ac   : > { %2367 = vmatprep.mubr.msk.bf16.mxu1 %vm2607_vm0, %v2606_v1 }
 0x26e   : > { %v1271_v45 = vpop.f32.mrb[8].mxu1 }
 0x26f   : > { %v1272_v46 = vadd.f32 %v2246_v44, %v1271_v45  ;;  %v2339_v47 = vpop.f32.mrb[9].mxu1 }
 0x270   : > { %v1274_v48 = vpop.f32.mrb[10].mxu1  ;;  %v1363_v49 = vpop.f32.mrb[0].mxu0 }
 0x271   : > { %v1364_v50 = vadd.f32 %v2246_v44, %v1363_v49  ;;  %v2340_v51 = vpop.f32.mrb[11].mxu1  ;;  %v2351_v52 = vpop.f32.mrb[1].mxu0  ;;  %v1415_v53 = vsel %vm1230_vm3, %v1272_v46, -inf }
 0x272   : > { %v1366_v54 = vpop.f32.mrb[2].mxu0  ;;  %1416 = vmax.xlane.f32.xlu0 %v1415_v53 }
 0x273   : > { %v2352_v55 = vpop.f32.mrb[3].mxu0  ;;  %v1421_v56 = vsel %vm1230_vm3, %v1364_v50, -inf }
 0x276   : > { %1422 = vmax.xlane.f32.xlu0 %v1421_v56  ;;  %v1317_v57 = vpop.f32.mrb[12].mxu1 }
 0x277   : > { %v1318_v58 = vadd.f32 %v2246_v44, %v1317_v57  ;;  %v2345_v59 = vpop.f32.mrb[13].mxu1 }
 0x278   : > { %v1320_v60 = vpop.f32.mrb[14].mxu1 }
 0x279   : > { %v2346_v61 = vpop.f32.mrb[15].mxu1  ;;  %v1418_v62 = vsel %vm1230_vm3, %v1318_v58, -inf }
 0x27a   : > { %1419 = vmax.xlane.f32.xlu1 %v1418_v62 }
 0x27e   : > { %v1409_v63 = vpop.f32.mrb[16].mxu1 }
 0x27f   : > { %v1410_v0 = vadd.f32 %v2246_v44, %v1409_v63  ;;  %v2357_v3 = vpop.f32.mrb[17].mxu1 }
 0x280   : > { %v1412_v5 = vpop.f32.mrb[18].mxu1 }
 0x281   : > { %v2358_v2 = vpop.f32.mrb[19].mxu1  ;;  %v1424_v6 = vsel %vm1230_vm3, %v1410_v0, -inf }
 0x282   : > { %1425 = vmax.xlane.f32.xlu0 %v1424_v6 }
 0x28b   : > { %797 = vrot.lane.b32.xlu1 %v2802_v12, %s2614_s30 }
 0x28f   : > { %801 = vrot.lane.b32.xlu1 %v2822_v37, %s2614_s30 }
 0x293   : > { %803 = vrot.lane.b32.xlu1 %v2812_v30, %s2614_s30 }
 0x298   : > { %799 = vrot.lane.b32.xlu0 %v2814_v31, %s2614_s30  ;;  %s2138_s30 = scalar_lea.sflag [#allocation5], %s535_s17 }
 0x2ff   : > { %v1417_v7 = vpop.xlane.xlu0 %1416 }
 0x300   : > { %v1427_v8 = vsub.f32 %v1272_v46, %v1417_v7 }
 0x302   : > { %v1431_v9 = vmul.f32 1.442695, %v1427_v8 }
 0x303   : > { %v1423_v10 = vpop.xlane.xlu0 %1422 }
 0x304   : > { %2502 = vpow2.f32 %v1431_v9  ;;  %v1429_v11 = vsub.f32 %v1364_v50, %v1423_v10 }
 0x306   : > { %v1435_v13 = vmul.f32 1.442695, %v1429_v11 }
 0x307   : > { %v1420_v14 = vpop.xlane.xlu1 %1419 }
 0x308   : > { %2504 = vpow2.f32 %v1435_v13  ;;  %v1428_v15 = vsub.f32 %v1318_v58, %v1420_v14 }
 0x30a   : > { %v1433_v16 = vmul.f32 1.442695, %v1428_v15 }
 0x30b   : > { %v798_v17 = vpop.permute.xlu1 %797 }
 0x30c   : > { %2506 = vpow2.f32 %v1433_v16  ;;  %v812_v31 = vrot.slane %v798_v17, %v2810_v29 }
 0x30e   : > { %v2900_v12 = vpop.eup %2502 }
 0x30f   : > { %v802_v37 = vpop.permute.xlu1 %801  ;;  %v1426_v18 = vpop.xlane.xlu0 %1425  ;;  %v1439_v30 = vsel %vm1230_vm3, %v2900_v12, 0.0 }
 0x310   : > { %v820_v19 = vrot.slane %v802_v37, %v2810_v29  ;;  %v1430_v20 = vsub.f32 %v1410_v0, %v1426_v18  ;;  %1440 = vadd.xlane.f32.xlu0 %v1439_v30 }
 0x312   : > { %v2906_v21 = vpop.eup %2504  ;;  %v821_v22 = vcombine.low %v812_v31, %v820_v19  ;;  %v822_v23 = vcombine.high %v812_v31, %v820_v19  ;;  %v1437_v24 = vmul.f32 1.442695, %v1430_v20 }
 0x313   : > { %v804_v25 = vpop.permute.xlu1 %803  ;;  %v800_v26 = vpop.permute.xlu0 %799  ;;  %v1445_v27 = vsel %vm1230_vm3, %v2906_v21, 0.0 }
 0x314   : > { %v829_v28 = vrot.slane %v821_v22, %v2818_v33  ;;  %2508 = vpow2.f32 %v1437_v24  ;;  %v854_v32 = vrot.slane %v804_v25, %v2810_v29  ;;  %1446 = vadd.xlane.f32.xlu0 %v1445_v27  ;;  %v846_v34 = vrot.slane %v800_v26, %v2810_v29 }
 0x315   : > { %v836_v36 = vrot.slane %v822_v23, %v2818_v33 }
 0x316   : > { %v2913_v35 = vpop.eup %2506  ;;  %v855_v38 = vcombine.low %v846_v34, %v854_v32  ;;  %v856_v39 = vcombine.high %v846_v34, %v854_v32  ;;  %v837_v41 = vcombine.high %v829_v28, %v2613_v42  ;;  %v877_v46 = vshrl.u32 %v829_v28, 16 }
 0x317   : > { %v1442_v40 = vsel %vm1230_vm3, %v2913_v35, 0.0  ;;  %v838_v45 = vcombine.high %v836_v36, %v2613_v42  ;;  %v893_v52 = vshrl.u32 %v836_v36, 16 }
 0x318   : > { %1443 = vadd.xlane.f32.xlu1 %v1442_v40  ;;  %v863_v43 = vrot.slane %v855_v38, %v2818_v33  ;;  %v870_v44 = vrot.slane %v856_v39, %v2818_v33  ;;  %v885_v51 = vshrl.u32 %v837_v41, 16 }
 0x319   : > { %v901_v60 = vshrl.u32 %v838_v45, 16 }
 0x31a   : > { %v871_v47 = vcombine.high %v863_v43, %v2613_v42  ;;  %v872_v48 = vcombine.high %v870_v44, %v2613_v42  ;;  %v875_v49 = vpack.i.b16 %v863_v43, %v829_v28  ;;  %v878_v50 = vshrl.u32 %v863_v43, 16 }
 0x31b   : > { %v891_v53 = vpack.i.b16 %v870_v44, %v836_v36  ;;  %v894_v54 = vshrl.u32 %v870_v44, 16 }
 0x31c   : > { %v879_v55 = vpack.i.b16 %v878_v50, %v877_v46  ;;  %v883_v56 = vpack.i.b16 %v871_v47, %v837_v41  ;;  %v886_v57 = vshrl.u32 %v871_v47, 16  ;;  %v899_v58 = vpack.i.b16 %v872_v48, %v838_v45 }
 0x31d   : > { %v895_v61 = vpack.i.b16 %v894_v54, %v893_v52  ;;  %v902_v62 = vshrl.u32 %v872_v48, 16  ;;  %v905_v63 = vcombine.low %v875_v49, %v891_v53 }
 0x31e   : > { %v2924_v59 = vpop.eup %2508  ;;  %v887_v0 = vpack.i.b16 %v886_v57, %v885_v51  ;;  %v913_v3 = vcombine.low %v883_v56, %v899_v58 }
 0x31f   : > { %v1448_v5 = vsel %vm1230_vm3, %v2924_v59, 0.0  ;;  %v903_v2 = vpack.i.b16 %v902_v62, %v901_v60  ;;  %v930_v6 = vcombine.low %v879_v55, %v895_v61  ;;  %v912_v7 = vrot.slane %v905_v63, %v2810_v29 }
 0x320   : > { %1449 = vadd.xlane.f32.xlu0 %v1448_v5  ;;  %v920_v8 = vrot.slane %v913_v3, %v2810_v29 }
 0x321   : > { %v938_v9 = vcombine.low %v887_v0, %v903_v2  ;;  %v937_v11 = vrot.slane %v930_v6, %v2810_v29 }
 0x322   : > { %v921_v10 = vcombine.low %v912_v7, %v920_v8 }
 0x323   : > { %v945_v13 = vrot.slane %v938_v9, %v2810_v29 }
 0x324   : > { %v928_v14 = vrot.slane %v921_v10, %v2818_v33 }
 0x325   : > { %v946_v15 = vcombine.low %v937_v11, %v945_v13 }
 0x326   : > { %v929_v16 = vcombine.high %v928_v14, %v2613_v42  ;;  %v959_v30 = vshrl.u32 %v928_v14, 16 }
 0x327   : > { %v953_v17 = vrot.slane %v946_v15, %v2818_v33 }
 0x328   : > { %v967_v22 = vshrl.u32 %v929_v16, 16 }
 0x329   : > { %v954_v37 = vcombine.high %v953_v17, %v2613_v42  ;;  %v957_v18 = vpack.i.b16 %v953_v17, %v928_v14  ;;  %v960_v31 = vshrl.u32 %v953_v17, 16 }
 0x32b   : > { %v961_v19 = vpack.i.b16 %v960_v31, %v959_v30  ;;  %v965_v20 = vpack.i.b16 %v954_v37, %v929_v16  ;;  %v968_v23 = vshrl.u32 %v954_v37, 16  ;;  %971 = vst.msk [vmem:[#allocation3] sm:$0xf] %vm792_vm2, %v957_v18  ;;  %v2490_v18 = vld [vmem:[%s3121_s6] sm:$0xff]  }
 0x32d   : > { %v969_v24 = vpack.i.b16 %v968_v23, %v967_v22  ;;  %972 = vst.msk [vmem:[#allocation3 + $0x4] sm:$0xf] %vm792_vm2, %v961_v19  ;;  %973 = vst.msk [vmem:[#allocation3 + $0x8] sm:$0xf] %vm792_vm2, %v965_v20 }
 0x32f   : > { %974 = vst.msk [vmem:[#allocation3 + $0xc] sm:$0xf] %vm792_vm2, %v969_v24 }
 0x332   : > { %v1219_v25 = vld [vmem:[#allocation3] sm:$0xf] }
 0x333   : > { %v1468_v42 = vsel %vm1466_vm4, %v1219_v25, 0 }
 0x334   : > { %2360 = vmatpush3.bf16.msra.mxu0 %v1468_v42  ;;  %v1220_v26 = vld [vmem:[#allocation3 + $0x4] sm:$0xf]  ;;  %v1221_v39 = vld [vmem:[#allocation3 + $0x8] sm:$0xf] }
 0x335   : > { %v1514_v27 = vsel %vm1466_vm4, %v1220_v26, 0  ;;  %2371 = vmatprep.subr.bf16.mxu0 %v2606_v1  ;;  %v1560_v43 = vsel %vm1466_vm4, %v1221_v39, 0 }
 0x336   : > { %2366 = vmatpush3.bf16.msra.mxu1 %v1514_v27  ;;  %v1222_v47 = vld [vmem:[#allocation3 + $0xc] sm:$0xf] }
 0x337   : > { %2377 = vmatprep.subr.bf16.mxu1 %v2606_v1  ;;  %v1606_v50 = vsel %vm1466_vm4, %v1222_v47, 0 }
 0x39d   : > { %v1441_v28 = vpop.xlane.xlu0 %1440 }
 0x39e   : > { %2510 = vrcp.f32 %v1441_v28 }
 0x3a1   : > { %v1447_v32 = vpop.xlane.xlu0 %1446 }
 0x3a2   : > { %2512 = vrcp.f32 %v1447_v32  ;;  %v2491_v32 = vld [vmem:[%s3121_s6 + $0x8] sm:$0xff]  }
 0x3a5   : > { %v1444_v34 = vpop.xlane.xlu1 %1443 }
 0x3a6   : > { %2514 = vrcp.f32 %v1444_v34 }
 0x3a8   : > { %v2511_v36 = vpop.eup %2510 }
 0x3a9   : > { %v1455_v38 = vmul.f32 %v2511_v36, %v2900_v12 }
 0x3ab   : > { %v1459_v40 = vpack.c.bf16 %v1455_v38, %v1455_v38 }
 0x3ac   : > { %v2513_v41 = vpop.eup %2512 }
 0x3ad   : > { %2362 = vmatmul.mubr.msk.bf16.vlgmr.msra.gmra.mrb[4].mxu0 %vm1230_vm3, %v1459_v40  ;;  %v1450_v44 = vpop.xlane.xlu0 %1449  ;;  %v1457_v45 = vmul.f32 %v2513_v41, %v2906_v21 }
 0x3ae   : > { %2372 = vmatpush3.bf16.msra.mxu0 %v1560_v43  ;;  %2516 = vrcp.f32 %v1450_v44  ;;  %2373 = vmatprep.mubr.msk.bf16.mxu0 %vm2607_vm0, %v2606_v1 }
 0x3af   : > { %2383 = vmatprep.subr.bf16.mxu0 %v2606_v1  ;;  %v1461_v49 = vpack.c.bf16 %v1457_v45, %v1457_v45 }
 0x3b0   : > { %v2515_v46 = vpop.eup %2514 }
 0x3b1   : > { %v1456_v12 = vmul.f32 %v2515_v46, %v2913_v35 }
 0x3b3   : > { %v1460_v48 = vpack.c.bf16 %v1456_v12, %v1456_v12 }
 0x3b5   : > { %2368 = vmatmul.mubr.msk.bf16.vlgmr.msra.gmra.mrb[20].mxu1 %vm1230_vm3, %v1460_v48  ;;  %2374 = vmatmul.mubr.msk.bf16.vlgmr.msra.gmra.mrb[8].mxu0 %vm1230_vm3, %v1461_v49 }
 0x3b6   : > { %2378 = vmatpush3.bf16.msra.mxu1 %v1606_v50  ;;  %2379 = vmatprep.mubr.msk.bf16.mxu1 %vm2607_vm0, %v2606_v1 }
 0x3b7   : > { %2387 = vmatprep.mubr.msk.bf16.mxu0 %vm2607_vm0, %v2606_v1  ;;  %2391 = vmatprep.subr.bf16.mxu1 %v2606_v1 }
 0x3b8   : > { %v2517_v21 = vpop.eup %2516  ;;  %2384 = vmatpush3.bf16.msra.mxu0 %v2490_v18  ;;  %v2499_v18 = vld [vmem:[%s3127_s12 + $0x28] sm:$0xff]  }
 0x3b9   : > { %v1458_v35 = vmul.f32 %v2517_v21, %v2924_v59  ;;  %2385 = vmatprep.subr.bf16.mxu0 %v2606_v1 }
 0x3bb   : > { %v1462_v51 = vpack.c.bf16 %v1458_v35, %v1458_v35 }
 0x3bc   : > { %2386 = vmatpush3.bf16.msra.mxu0 %v2491_v32 }
 0x3bd   : > { %2380 = vmatmul.mubr.msk.bf16.vlgmr.msra.gmra.mrb[24].mxu1 %vm1230_vm3, %v1462_v51  ;;  %2399 = vmatprep.subr.bf16.mxu0 %v2606_v1  ;;  %v2257_v51 = vld [vmem:[%s3122_s7] ss:$0 sm:$0xff] }
 0x3be   : > { %2395 = vmatprep.mubr.msk.bf16.mxu1 %vm2607_vm0, %v2606_v1 }
 0x480   : > { %v1504_v52 = vpop.f32.mrb[4].mxu0 }
 0x481   : > { %v2363_v53 = vpop.f32.mrb[5].mxu0 }
 0x482   : > { %v1507_v54 = vpop.f32.mrb[6].mxu0 }
 0x483   : > { %v2364_v55 = vpop.f32.mrb[7].mxu0 }
 0x488   : > { %v1550_v56 = vpop.f32.mrb[20].mxu1  ;;  %v1596_v57 = vpop.f32.mrb[8].mxu0 }
 0x489   : > { %v1648_v58 = vcombine.low %v1504_v52, %v1596_v57  ;;  %v1649_v60 = vcombine.high %v1504_v52, %v1596_v57  ;;  %v2369_v61 = vpop.f32.mrb[21].mxu1  ;;  %v2375_v62 = vpop.f32.mrb[9].mxu0 }
 0x48a   : > { %v1553_v63 = vpop.f32.mrb[22].mxu1  ;;  %v1599_v0 = vpop.f32.mrb[10].mxu0 }
 0x48b   : > { %v2370_v3 = vpop.f32.mrb[23].mxu1  ;;  %v2376_v59 = vpop.f32.mrb[11].mxu0  ;;  %v1656_v9 = vrot.slane %v1648_v58, %v2810_v29  ;;  %v1663_v10 = vrot.slane %v1649_v60, %v2810_v29 }
 0x48c   : > { %v2492_v3 = vld [vmem:[%s3125_s10] sm:$0xff]   ;;  %v2493_v59 = vld [vmem:[%s3125_s10 + $0x8] sm:$0xff]  }
 0x48d   : > { %2392 = vmatpush3.bf16.msra.mxu1 %v2492_v3 }
 0x48e   : > { %2393 = vmatprep.subr.bf16.mxu1 %v2606_v1 }
 0x490   : > { %v1642_v5 = vpop.f32.mrb[24].mxu1 }
 0x491   : > { %v1664_v2 = vcombine.low %v1550_v56, %v1642_v5  ;;  %v1665_v6 = vcombine.high %v1550_v56, %v1642_v5  ;;  %v2381_v7 = vpop.f32.mrb[25].mxu1  ;;  %2394 = vmatpush3.bf16.msra.mxu1 %v2493_v59 }
 0x492   : > { %v1645_v8 = vpop.f32.mrb[26].mxu1  ;;  %v2261_v7 = vld [vmem:[%s3123_s8] ss:$0 sm:$0xff] }
 0x493   : > { %v1672_v11 = vrot.slane %v1664_v2, %v2810_v29  ;;  %v1679_v13 = vrot.slane %v1665_v6, %v2810_v29  ;;  %v2382_v14 = vpop.f32.mrb[27].mxu1 }
 0x494   : > { %v2494_v14 = vld [vmem:[%s3127_s12] sm:$0xff]  }
 0x495   : > { %v1680_v15 = vcombine.low %v1656_v9, %v1672_v11  ;;  %v1681_v16 = vcombine.high %v1656_v9, %v1672_v11  ;;  %v1696_v17 = vcombine.low %v1663_v10, %v1679_v13  ;;  %v1697_v37 = vcombine.high %v1663_v10, %v1679_v13  ;;  %v2262_v9 = vld [vmem:[%s3124_s9] ss:$0 sm:$0xff] }
 0x497   : > { %v1688_v30 = vrot.slane %v1680_v15, %v2818_v33  ;;  %v1695_v31 = vrot.slane %v1681_v16, %v2818_v33  ;;  %v1704_v19 = vrot.slane %v1696_v17, %v2818_v33  ;;  %v1711_v20 = vrot.slane %v1697_v37, %v2818_v33  ;;  %v2495_v15 = vld [vmem:[%s3127_s12 + $0x8] sm:$0xff]   ;;  %v2496_v16 = vld [vmem:[%s3127_s12 + $0x10] sm:$0xff]   ;;  %v2497_v17 = vld [vmem:[%s3127_s12 + $0x18] sm:$0xff]  }
 0x498   : > { %v2498_v37 = vld [vmem:[%s3127_s12 + $0x20] sm:$0xff]  }
 0x499   : > { %v1716_v22 = vcombine.low %v1688_v30, %v1695_v31  ;;  %v2255_v23 = vcombine.high %v1688_v30, %v1695_v31  ;;  %v1732_v24 = vcombine.low %v1704_v19, %v1711_v20  ;;  %v2256_v25 = vcombine.high %v1704_v19, %v1711_v20  ;;  %v2500_v30 = vld [vmem:[%s3127_s12 + $0x30] sm:$0xff]   ;;  %v2501_v31 = vld [vmem:[%s3127_s12 + $0x38] sm:$0xff]   ;;  %v2264_v19 = vld [vmem:[%s3126_s11] ss:$0 sm:$0xff] }
 0x49b   : > { %v1723_v42 = vrot.slane %v1716_v22, %v2810_v29  ;;  %v1731_v26 = vrot.slane %v2255_v23, %v2810_v29  ;;  %v1739_v27 = vrot.slane %v1732_v24, %v2810_v29  ;;  %v1747_v28 = vrot.slane %v2256_v25, %v2810_v29 }
 0x49d   : > { %v1749_v34 = vcombine.high %v1723_v42, %v1731_v26  ;;  %v1765_v36 = vcombine.high %v1739_v27, %v1747_v28  ;;  %v1748_v38 = vcombine.low %v1723_v42, %v1731_v26  ;;  %v1764_v39 = vcombine.low %v1739_v27, %v1747_v28 }
 0x49f   : > { %v1763_v40 = vrot.slane %v1749_v34, %v2818_v33  ;;  %v1779_v41 = vrot.slane %v1765_v36, %v2818_v33  ;;  %v1756_v43 = vrot.slane %v1748_v38, %v2818_v33  ;;  %v1772_v44 = vrot.slane %v1764_v39, %v2818_v33 }
 0x4a1   : > { %v1782_v29 = vcombine.low %v1763_v40, %v1779_v41  ;;  %v1781_v45 = vcombine.high %v1756_v43, %v1772_v44  ;;  %v1783_v46 = vcombine.high %v1763_v40, %v1779_v41  ;;  %v1780_v12 = vcombine.low %v1756_v43, %v1772_v44 }
 0x4a3   : > { %1789 = vrot.lane.b32.xlu0 %v1782_v29, %s2615_s20  ;;  %1785 = vrot.lane.b32.xlu1 %v1781_v45, %s2616_s27  ;;  %s537_s20 = scalar_lea.vmem [#allocation4], %s2236_s4  ;;  %s2530_s4 = sshll.u32 %s2618_s24, 4  ;;  %s2531_s4 = int_to_ptr.vmem [resolvable:$false] %s2530_s4 }
 0x4a4   : > { %s2152_s27 = sshll.u32 %s537_s20, 4  ;;  %s2532_s23 = scalar_lea.vmem %s2531_s4, 256  ;;  %s3069_s27 = int_to_ptr.vmem [resolvable:$true] %s2152_s27 }
 0x4a5   : > { %s2526_s25 = scalar_lea.vmem %s3069_s27, 128  ;;  %p2533_p1 = scmp.lt.s32.totalorder %s3069_s27, %s2531_s4 }
 0x4a6   : > { %p2527_p12 = scmp.ne.s32.totalorder %s3069_s27, %s2526_s25  ;;  %p2534_p2 = scmp.lt.s32.totalorder %s2532_s23, %s2526_s25 }
 0x4a7   : > { %1793 = vrot.lane.b32.xlu1 %v1783_v46, %s2617_s28 }
 0x4a8   : > { %p2528_p13 = pnand %p2527_p12, %p2744_p4  ;;  %p2535_p3 = por %p2534_p2, %p2533_p1 }
 0x4aa   : > { %p2529_p0 = pneg %p2528_p13 }
 0x4ac   : > { %p2536_p5 = pnand %p2535_p3, %p2529_p0 }
 0x515   : > { %v1786_v47 = vpop.permute.xlu1 %1785  ;;  %v1790_v48 = vpop.permute.xlu0 %1789 }
 0x516   : > { %v1796_v49 = vsel %vm1230_vm3, %v1780_v12, %v1786_v47 }
 0x517   : > { %v1798_v21 = vsel %vm1797_vm5, %v1796_v49, %v1790_v48 }
 0x519   : > { %v1794_v50 = vpop.permute.xlu1 %1793 }
 0x51a   : > { %v1800_v35 = vsel %vm1799_vm6, %v1798_v21, %v1794_v50 }
 0x51b   : > { %v1801_v33 = vpack.c.bf16 %v1800_v35, %v1800_v35 }
 0x51d   : > { %2388 = vmatmul.mubr.msk.bf16.vlgmr.msra.gmra.mrb[12].mxu0 %vm575_vm1, %v1801_v33 }
 0x51e   : > { %2415 = vmatprep.mubr.msk.bf16.mxu0 %vm2607_vm0, %v2606_v1  ;;  %2400 = vmatpush3.bf16.msra.mxu0 %v2494_v14 }
 0x51f   : > { %2401 = vmatprep.subr.bf16.mxu0 %v2606_v1 }
 0x522   : > { %2402 = vmatpush3.bf16.msra.mxu0 %v2495_v15 }
 0x523   : > { %2403 = vmatprep.subr.bf16.mxu0 %v2606_v1 }
 0x526   : > { %2404 = vmatpush3.bf16.msra.mxu0 %v2496_v16 }
 0x527   : > { %2405 = vmatprep.subr.bf16.mxu0 %v2606_v1 }
 0x52a   : > { %2406 = vmatpush3.bf16.msra.mxu0 %v2497_v17 }
 0x52b   : > { %2407 = vmatprep.subr.bf16.mxu0 %v2606_v1 }
 0x52e   : > { %2408 = vmatpush3.bf16.msra.mxu0 %v2498_v37 }
 0x52f   : > { %2409 = vmatprep.subr.bf16.mxu0 %v2606_v1 }
 0x532   : > { %2410 = vmatpush3.bf16.msra.mxu0 %v2499_v18 }
 0x533   : > { %2411 = vmatprep.subr.bf16.mxu0 %v2606_v1 }
 0x536   : > { %2412 = vmatpush3.bf16.msra.mxu0 %v2500_v30 }
 0x537   : > { %2413 = vmatprep.subr.bf16.mxu0 %v2606_v1 }
 0x53a   : > { %2414 = vmatpush3.bf16.msra.mxu0 %v2501_v31 }
 0x5f0   : > { %v1862_v52 = vpop.f32.mrb[12].mxu0 }
 0x5f1   : > { %v1863_v53 = vadd.f32 %v2257_v51, %v1862_v52  ;;  %v2389_v54 = vpop.f32.mrb[13].mxu0  ;;  %v2263_v52 = vld [vmem:[%s3128_s13] ss:$0 sm:$0xff] }
 0x5f2   : > { %v1865_v55 = vpop.f32.mrb[14].mxu0 }
 0x5f3   : > { %v2390_v56 = vpop.f32.mrb[15].mxu0  ;;  %v1868_v57 = vadd.f32 %v1863_v53, %v2784_v4 }
 0x5f5   : > { %v1871_v58 = vsel %vm575_vm1, %v1868_v57, 0.0 }
 0x5f6   : > { %1872 = vadd.xlane.f32.xlu1 %v1871_v58 }
 0x683   : > { %v1873_v60 = vpop.xlane.xlu1 %1872 }
 0x684   : > { %v1875_v61 = vmul.f32 0.03125, %v1873_v60 }
 0x686   : > { %v1876_v62 = vsub.f32 %v1868_v57, %v1875_v61 }
 0x688   : > { %v1877_v63 = vmul.f32 %v1876_v62, %v1876_v62 }
 0x68a   : > { %v1878_v0 = vsel %vm575_vm1, %v1877_v63, 0.0 }
 0x68b   : > { %1879 = vadd.xlane.f32.xlu0 %v1878_v0 }
 0x718   : > { %v1880_v4 = vpop.xlane.xlu0 %1879 }
 0x719   : > { %v1881_v5 = vmul.f32 0.03125, %v1880_v4 }
 0x71b   : > { %v1882_v2 = vadd.f32 1e-12, %v1881_v5 }
 0x71d   : > { %2518 = vrsqrt.f32 %v1882_v2 }
 0x727   : > { %v2519_v6 = vpop.eup %2518 }
 0x728   : > { %v1884_v8 = vmul.f32 %v2519_v6, %v1876_v62  ;;  %v2276_v6 = vld [vmem:[%s3129_s14] ss:$0 sm:$0xff] }
 0x72a   : > { %v1891_v10 = vmul.f32 %v2261_v7, %v1884_v8  ;;  %v2277_v8 = vld [vmem:[%s3130_s15] ss:$0 sm:$0xff] }
 0x72c   : > { %v3011_v11 = vadd.f32 %v2262_v9, %v1891_v10 }
 0x72e   : > { %v1899_v13 = vpack.c.bf16 %v3011_v11, %v3011_v11 }
 0x730   : > { %2396 = vmatmul.mubr.msk.bf16.vlgmr.msra.gmra.mrb[28].mxu1 %vm575_vm1, %v1899_v13 }
 0x803   : > { %v1968_v20 = vpop.f32.mrb[28].mxu1 }
 0x804   : > { %v1969_v22 = vadd.f32 %v2264_v19, %v1968_v20  ;;  %v2397_v23 = vpop.f32.mrb[29].mxu1 }
 0x805   : > { %v1971_v24 = vpop.f32.mrb[30].mxu1 }
 0x806   : > { %v1975_v25 = vmul.f32 0.70710677, %v1969_v22  ;;  %v2398_v42 = vpop.f32.mrb[31].mxu1  ;;  %v1974_v21 = vmul.f32 0.5, %v1969_v22 }
 0x808   : > { %v1976_v26 = vand.u32 2147483647, %v1975_v25  ;;  %vm1995_vm7 = vcmp.lt.f32.partialorder %v1975_v25, 0.0 }
 0x80a   : > { %v1977_v27 = vmul.f32 0.3275911, %v1976_v26  ;;  %v1989_v32 = vsub.f32 0.0, %v1976_v26 }
 0x80c   : > { %v1978_v28 = vadd.f32 1.0, %v1977_v27  ;;  %v1990_v36 = vmul.f32 %v1989_v32, %v1976_v26 }
 0x80e   : > { %2520 = vrcp.f32 %v1978_v28  ;;  %v1991_v39 = vmul.f32 1.442695, %v1990_v36 }
 0x810   : > { %2522 = vpow2.f32 %v1991_v39 }
 0x818   : > { %v2521_v34 = vpop.eup %2520 }
 0x819   : > { %v1980_v38 = vmul.f32 1.0614054, %v2521_v34 }
 0x81a   : > { %v2523_v12 = vpop.eup %2522 }
 0x81b   : > { %v1981_v1 = vadd.f32 -1.4531521, %v1980_v38 }
 0x81d   : > { %v1982_v40 = vmul.f32 %v2521_v34, %v1981_v1 }
 0x81f   : > { %v1983_v41 = vadd.f32 1.4214138, %v1982_v40 }
 0x821   : > { %v1984_v43 = vmul.f32 %v2521_v34, %v1983_v41 }
 0x823   : > { %v1985_v44 = vadd.f32 -0.28449672, %v1984_v43 }
 0x825   : > { %v1986_v29 = vmul.f32 %v2521_v34, %v1985_v44 }
 0x827   : > { %v1987_v45 = vadd.f32 0.2548296, %v1986_v29 }
 0x829   : > { %v1988_v46 = vmul.f32 %v2521_v34, %v1987_v45 }
 0x82b   : > { %v1993_v47 = vmul.f32 %v2523_v12, %v1988_v46 }
 0x82d   : > { %v1994_v48 = vsub.f32 1.0, %v1993_v47 }
 0x82f   : > { %v1996_v49 = vsub.f32 0.0, %v1994_v48 }
 0x831   : > { %v1997_v50 = vsel %vm1995_vm7, %v1996_v49, %v1994_v48 }
 0x832   : > { %v1998_v35 = vadd.f32 1.0, %v1997_v50 }
 0x834   : > { %v1999_v33 = vmul.f32 %v1998_v35, %v1974_v21 }
 0x836   : > { %v2000_v51 = vpack.c.bf16 %v1999_v33, %v1999_v33 }
 0x838   : > { %2416 = vmatmul.mubr.bf16.vlgmr.msra.gmra.mrb[16].mxu0 %v2000_v51 }
 0x90b   : > { %v2099_v53 = vpop.f32.mrb[16].mxu0 }
 0x90c   : > { %v2105_v54 = vadd.f32 %v2263_v52, %v2099_v53  ;;  %v2417_v55 = vpop.f32.mrb[17].mxu0 }
 0x90d   : > { %v2102_v56 = vpop.f32.mrb[18].mxu0 }
 0x90e   : > { %v2418_v57 = vpop.f32.mrb[19].mxu0  ;;  %v2106_v58 = vadd.f32 %v2105_v54, %v3011_v11 }
 0x910   : > { %v2109_v60 = vsel %vm575_vm1, %v2106_v58, 0.0 }
 0x911   : > { %2110 = vadd.xlane.f32.xlu0 %v2109_v60 }
 0x99e   : > { %v2111_v61 = vpop.xlane.xlu0 %2110 }
 0x99f   : > { %v2112_v62 = vmul.f32 0.03125, %v2111_v61 }
 0x9a1   : > { %v2113_v63 = vsub.f32 %v2106_v58, %v2112_v62 }
 0x9a3   : > { %v2114_v0 = vmul.f32 %v2113_v63, %v2113_v63 }
 0x9a5   : > { %v2115_v3 = vsel %vm575_vm1, %v2114_v0, 0.0 }
 0x9a6   : > { %2116 = vadd.xlane.f32.xlu1 %v2115_v3 }
 0xa33   : > { %v2117_v59 = vpop.xlane.xlu1 %2116 }
 0xa34   : > { %v2118_v4 = vmul.f32 0.03125, %v2117_v59 }
 0xa36   : > { %v2119_v5 = vadd.f32 1e-12, %v2118_v4 }
 0xa38   : > { %2524 = vrsqrt.f32 %v2119_v5 }
 0xa42   : > { %v2525_v2 = vpop.eup %2524 }
 0xa43   : > { %v2121_v7 = vmul.f32 %v2525_v2, %v2113_v63 }
 0xa45   : > { %v2128_v9 = vmul.f32 %v2276_v6, %v2121_v7 }
 0xa47   : > { %v2135_v10 = vadd.f32 %v2277_v8, %v2128_v9 }
 0xa49   : > { %2136 = vst.msk [vmem:[%s537_s20] sm:$0xff] %vm575_vm1, %v2135_v10 }
 0xa4a   : > { %2539 = shalt.err (!%p2536_p5)
}
 0xa4b   : > { %s2540_s1 = scalar_lea.hbm %s3067_s2, 128  ;;  %s2544_s19 = scalar_lea.hbm %s3131_s16, 256 }
 0xa4c   : > { %p2541_p6 = scmp.ne.s32.totalorder %s3067_s2, %s2540_s1  ;;  %p2545_p10 = scmp.lt.u32.totalorder %s3067_s2, %s3131_s16 }
 0xa4d   : > { %p2546_p11 = scmp.lt.u32.totalorder %s2544_s19, %s2540_s1  ;;  %p2548_p13 = scmp.lt.u32.totalorder %s2540_s1, %s3067_s2 }
 0xa4e   : > { %p2542_p7 = pnand %p2541_p6, %p2744_p4 }
 0xa4f   : > { %p2547_p12 = por %p2546_p11, %p2545_p10 }
 0xa50   : > { %p2543_p9 = pneg %p2542_p7 }
 0xa51   : > { %p2549_p0 = por %p2548_p13, %p2547_p12 }
 0xa53   : > { %p2550_p1 = pnand %p2549_p0, %p2543_p9 }
 0xa55   : > { %2553 = shalt.err (!%p2550_p1)
}
 0xa56   : > { %2419 = dma.vmem_to_hbm [thread:$0]  (%p2744_p4), %s3069_s27, 128, %s3067_s2, %s2138_s30  }
 0xa57 PF: > { %p2425_p2 = scmp.ge.s32.totalorder %s2604_s26, 2  ;;  %s2164_s25 = sand.u32 1, %s2584_s21  }
 0xa58   : > { %s2165_s24 = scalar_lea.sflag [#allocation5], %s2164_s25 }
 0xa59   : > { %p2422_p3 = pnand %p2425_p2, %p2751_p8 }
 0xa5b   : > { %2579 = dma.done.wait (!%p2422_p3), %s2165_s24, 128  }
 0xa5c   : > { %2581 = vsyncadd (!%p2422_p3), %s2165_s24, 4294967168  ;;  %s29_s26 = sadd.s32 1, %s2604_s26   ;;  %s3149_s4 = sld [smem:[#allocation7_spill]] }
 0xa5d   : > { %p26_p5 = scmp.ge.s32.totalorder %s29_s26, 4   ;;  %s3150_s23 = sld [smem:[#allocation10_spill]] }
 0xa5e   : > { %s3151_s24 = sld [smem:[#allocation8_spill]]  ;;  %s3152_s25 = sld [smem:[#allocation9_spill]] }
 0xa5f   : > { %s3153_s21 = smov %s2588_s22  ;;  %28 = sbr.rel (!%p26_p5) target bundleno = 9 (0x9), region = 127 }
 0xa62   : > { %s3154_s22 = smov %s3149_s4 }
 0xa66   :  { %2170 = vsyncpa [#allocation5], 1 }
 0xa67   :  { %2172 = vsyncpa [#allocation5 + $0x1], 1 }

</bundles_post_ra>
